<compile_context>
chip_gen: v7x
topology: tpu7x:2x2x1
jax: 0.10.0
libtpu: 0.0.40
codegen_flags: <defaults>
</compile_context>

<pallas_src>
import functools
import math

import jax
import jax.numpy as jnp
from jax import lax
from jax.experimental import pallas as pl
from jax.experimental.pallas import tpu as pltpu


# --------------------------------------------------------------------------- #
# Pallas kernel: full encoder stack; one (batch-block, layer) pair per grid step.
# --------------------------------------------------------------------------- #
def _encoder_stack_kernel(
    x_ref,       # (Bt, S, D)  embedded activations (only read at l == 0)
    wqkv_ref,    # (1, D, 3D)  fused QKV weight, bf16 (1/sqrt(hd) folded into Wq)
    wo_ref,      # (1, D, D)   out-projection weight, bf16
    wf1_ref,     # (1, D, D)   FFN weight 1, bf16
    wf2_ref,     # (1, D, D)   FFN weight 2, bf16
    vec_ref,     # (1, 16, D)  packed small per-layer vectors, f32
    o_ref,       # (Bt, S, D)  resident across the layer grid axis
    ctx_ref,     # VMEM scratch (Bt*S, D) bf16: staged per-head attention outputs
    *, n_heads: int, block_b: int, seq: int,
):
    l = pl.program_id(1)

    # Seed the resident activation buffer from the embedded input at layer 0.
    @pl.when(l == 0)
    def _():
        o_ref[...] = x_ref[...]

    D = o_ref.shape[-1]
    hd = D // n_heads
    M = block_b * seq

    vec = vec_ref[0]                                   # (16, D) f32
    bq, bk, bv = vec[0:1], vec[1:2], vec[2:3]          # bq already scaled by 1/sqrt(hd)
    bo = vec[3:4]
    g1, be1 = vec[4:5], vec[5:6]
    bf1, bf2 = vec[6:7], vec[7:8]
    g2, be2 = vec[8:9], vec[9:10]

    x = o_ref[...].astype(jnp.float32).reshape(M, D)   # (M, D) f32

    # ---- fused QKV projection: one (M, D) @ (D, 3D) MXU contraction -------- #
    qkv = jnp.dot(x.astype(jnp.bfloat16), wqkv_ref[0],
                  preferred_element_type=jnp.float32)                     # (M, 3D)
    q = (qkv[:, 0 * D:1 * D] + bq).astype(jnp.bfloat16)                   # scale pre-folded
    k = (qkv[:, 1 * D:2 * D] + bk).astype(jnp.bfloat16)
    v = (qkv[:, 2 * D:3 * D] + bv).astype(jnp.bfloat16)

    # ---- attention per (sequence, head); stage head outputs into scratch --- #
    for b in range(block_b):                           # static unroll (small)
        rows = slice(b * seq, (b + 1) * seq)
        for h in range(n_heads):
            cols = slice(h * hd, (h + 1) * hd)
            qh, kh, vh = q[rows, cols], k[rows, cols], v[rows, cols]
            s = jnp.dot(qh, kh.T, preferred_element_type=jnp.float32)     # (S, S)
            s = s - jnp.max(s, axis=-1, keepdims=True)
            p = jnp.exp(s)
            p = p * pl.reciprocal(jnp.sum(p, axis=-1, keepdims=True), approx=True)
            oh = jnp.dot(p.astype(jnp.bfloat16), vh,
                         preferred_element_type=jnp.float32)              # (S, hd)
            ctx_ref[rows, cols] = oh.astype(jnp.bfloat16)

    # ---- single full-K out-projection --------------------------------------#
    attn = jnp.dot(ctx_ref[...], wo_ref[0],
                   preferred_element_type=jnp.float32) + bo               # (M, D)

    # ---- residual + LayerNorm 1 (biased var, eps = 1e-12) ------------------ #
    y = x + attn
    mu = jnp.mean(y, axis=-1, keepdims=True)
    var = jnp.mean((y - mu) ** 2, axis=-1, keepdims=True)
    y = (y - mu) * lax.rsqrt(var + 1e-12)
    y = y * g1 + be1

    # ---- position-wise feed forward (ffn_hidden == d_model) ---------------- #
    h1 = jnp.dot(y.astype(jnp.bfloat16), wf1_ref[0],
                 preferred_element_type=jnp.float32) + bf1
    h1 = jnp.maximum(h1, 0.0)
    h2 = jnp.dot(h1.astype(jnp.bfloat16), wf2_ref[0],
                 preferred_element_type=jnp.float32) + bf2

    # ---- residual + LayerNorm 2 -------------------------------------------- #
    z = y + h2
    mu2 = jnp.mean(z, axis=-1, keepdims=True)
    var2 = jnp.mean((z - mu2) ** 2, axis=-1, keepdims=True)
    z = (z - mu2) * lax.rsqrt(var2 + 1e-12)
    z = z * g2 + be2

    o_ref[...] = z.reshape(block_b, seq, D).astype(o_ref.dtype)


def _pick_block_batch(B, S):
    """How many sequences to process per grid step."""
    # enough rows to fill the MXU M dimension (~256)
    target = max(1, pl.cdiv(256, S))
    bt = max(d for d in range(1, B + 1) if B % d == 0 and d <= target)
    # keep >= 2 parallel grid steps for v7x's two TensorCores when B allows it
    if B >= 2 and B // bt < 2:
        bt = max(d for d in range(1, B) if B % d == 0 and B // d >= 2)
    return bt


def _vmem_limit_bytes(bt, S, D):
    """Computed VMEM budget, clamped to 75% of physical VMEM on this chip."""
    act = bt * S * D * 4                           # one f32 activation block
    weights = 6 * D * D * 2 + 16 * D * 4           # one layer's weights + packed vecs
    need = 2 * 2 * act                             # double-buffered in + resident out
    need += 2 * weights                            # double-buffered weight stream
    need += bt * S * D * 2                         # ctx scratch (bf16)
    need += 6 * bt * S * D * 4                     # qkv / attn / ffn intermediates headroom
    try:
        phys = pltpu.get_tpu_info().vmem_capacity_bytes
    except Exception:
        phys = 64 * 1024 * 1024                    # assume the smallest (v7x) if query fails
    return int(min(max(need, 32 * 1024 * 1024), (phys * 3) // 4))


def encoder_stack(x, p, *, n_heads):
    """x: (B, S, D) float32; p: dict of stacked (L, ...) parameters."""
    B, S, D = x.shape
    L = p["wqkv"].shape[0]
    bt = _pick_block_batch(B, S)
    n_bsteps = B // bt

    x_spec = pl.BlockSpec((bt, S, D), lambda b, l: (b, 0, 0))

    def w_spec(rows, cols):
        # per-layer weight slab; last two dims are the full array dims.
        return pl.BlockSpec((1, rows, cols), lambda b, l: (l, 0, 0))

    in_specs = [
        x_spec,
        w_spec(D, 3 * D),      # wqkv
        w_spec(D, D),          # wo
        w_spec(D, D),          # wf1
        w_spec(D, D),          # wf2
        w_spec(16, D),         # packed small per-layer vectors
    ]

    flops = int(B * L * (12 * S * D * D + 4 * S * S * D))
    weight_bytes = L * (6 * D * D * 2 + 16 * D * 4)
    cost = pl.CostEstimate(
        flops=flops,
        transcendentals=int(B * L * n_heads * S * S),
        bytes_accessed=int(n_bsteps * weight_bytes + 2 * B * S * D * 4),
    )

    kernel = functools.partial(_encoder_stack_kernel,
                               n_heads=n_heads, block_b=bt, seq=S)

    return pl.pallas_call(
        kernel,
        out_shape=jax.ShapeDtypeStruct((B, S, D), x.dtype),
        grid=(n_bsteps, L),
        in_specs=in_specs,
        out_specs=x_spec,
        scratch_shapes=[pltpu.VMEM((bt * S, D), jnp.bfloat16)],
        compiler_params=pltpu.CompilerParams(
            dimension_semantics=("parallel", "arbitrary"),
            vmem_limit_bytes=_vmem_limit_bytes(bt, S, D),
        ),
        cost_estimate=cost,
    )(x, p["wqkv"], p["wo"], p["wf1"], p["wf2"], p["vec"])


# --------------------------------------------------------------------------- #
# Embedding glue (gather + sinusoidal positional encoding) — plain JAX.
# --------------------------------------------------------------------------- #
def sinusoidal_pe(max_len, d_model):
    pos = jnp.arange(max_len, dtype=jnp.float32)[:, None]
    i2 = jnp.arange(0, d_model, 2, dtype=jnp.float32)
    angle = pos / jnp.power(10000.0, i2 / d_model)
    pe = jnp.zeros((max_len, d_model), jnp.float32)
    pe = pe.at[:, 0::2].set(jnp.sin(angle))
    pe = pe.at[:, 1::2].set(jnp.cos(angle))
    return pe


def transformer_embedding(tok_ids, emb_table, pe):
    # TODO(synk): token-id gather stays in plain JAX (data-dependent gather is
    # not a good fit for a rectangular BlockSpec); dropout is identity (eval).
    B, S = tok_ids.shape
    return emb_table[tok_ids] + pe[:S][None, :, :]


# --------------------------------------------------------------------------- #
# Parameter init (deterministic) and full Encoder forward.
# --------------------------------------------------------------------------- #
def init_params(key, vocab_size, max_len, d_model, n_layers, n_heads):
    keys = jax.random.split(key, 1 + n_layers)
    emb_table = 0.02 * jax.random.normal(keys[0], (vocab_size, d_model), jnp.float32)
    emb_table = emb_table.at[1].set(0.0)          # nn.Embedding padding_idx=1

    D, L = d_model, n_layers
    hd = D // n_heads
    w_scale = 1.0 / math.sqrt(D)
    attn_scale = 1.0 / math.sqrt(hd)              # folded into Wq / bq below

    wqkv, wo, wf1, wf2, vec = [], [], [], [], []
    zeros_d = jnp.zeros((D,), jnp.float32)
    ones_d = jnp.ones((D,), jnp.float32)
    for i in range(L):
        ks = jax.random.split(keys[1 + i], 10)
        wq = w_scale * jax.random.normal(ks[0], (D, D), jnp.float32)
        wk = w_scale * jax.random.normal(ks[1], (D, D), jnp.float32)
        wv = w_scale * jax.random.normal(ks[2], (D, D), jnp.float32)
        wqkv.append(jnp.concatenate([wq * attn_scale, wk, wv], axis=-1))   # (D, 3D)
        wo.append(w_scale * jax.random.normal(ks[3], (D, D), jnp.float32))
        wf1.append(w_scale * jax.random.normal(ks[4], (D, D), jnp.float32))  # ffn_hidden == d_model
        wf2.append(w_scale * jax.random.normal(ks[5], (D, D), jnp.float32))

        bq = 0.02 * jax.random.normal(ks[6], (D,), jnp.float32) * attn_scale
        bk = 0.02 * jax.random.normal(ks[7], (D,), jnp.float32)
        bv = 0.02 * jax.random.normal(ks[8], (D,), jnp.float32)
        bo = 0.02 * jax.random.normal(ks[9], (D,), jnp.float32)
        rows = jnp.stack(
            [bq, bk, bv, bo,
             ones_d, zeros_d,          # g1, be1
             zeros_d, zeros_d,         # bf1, bf2
             ones_d, zeros_d]          # g2, be2
            + [zeros_d] * 6)                                                 # (16, D)
        vec.append(rows)

    params = dict(
        wqkv=jnp.stack(wqkv).astype(jnp.bfloat16),   # (L, D, 3D) bf16
        wo=jnp.stack(wo).astype(jnp.bfloat16),       # (L, D, D)  bf16
        wf1=jnp.stack(wf1).astype(jnp.bfloat16),
        wf2=jnp.stack(wf2).astype(jnp.bfloat16),
        vec=jnp.stack(vec),                          # (L, 16, D) f32
    )
    pe = sinusoidal_pe(max_len, d_model)
    return emb_table, pe, params


def encoder_forward(tok_ids, emb_table, pe, params, *, n_heads):
    x = transformer_embedding(tok_ids, emb_table, pe)     # (B, S, D)
    return encoder_stack(x, params, n_heads=n_heads)      # single fused pallas_call


# --------------------------------------------------------------------------- #
if __name__ == "__main__":
    # small demo config; d_model divisible by n_heads (original d_model=256 /
    # n_heads=6 would not split evenly, so a consistent small config is used).
    B, S = 2, 8
    D_MODEL = 32
    N_HEADS = 4
    N_LAYERS = 3
    VOCAB = 50
    MAX_LEN = 32

    key = jax.random.PRNGKey(0)
    k_tok, k_par = jax.random.split(key)
    tok_ids = jax.random.randint(k_tok, (B, S), 0, VOCAB, dtype=jnp.int32)

    emb_table, pe, params = init_params(k_par, VOCAB, MAX_LEN, D_MODEL,
                                        N_LAYERS, N_HEADS)

    out = encoder_forward(tok_ids, emb_table, pe, params, n_heads=N_HEADS)
    out = jax.block_until_ready(out)

    assert out.shape == (B, S, D_MODEL), out.shape
    assert bool(jnp.all(jnp.isfinite(out)))
    print("KERNEL_OK")
</pallas_src>

<mosaic_0001>
module attributes {stable_mosaic.version = 11 : i64} {
  func.func @_encoder_stack_kernel(%arg0: i32, %arg1: i32, %arg2: memref<1x8x32xf32, #tpu.memory_space<vmem>>, %arg3: memref<1x32x96xbf16, #tpu.memory_space<vmem>>, %arg4: memref<1x32x32xbf16, #tpu.memory_space<vmem>>, %arg5: memref<1x32x32xbf16, #tpu.memory_space<vmem>>, %arg6: memref<1x32x32xbf16, #tpu.memory_space<vmem>>, %arg7: memref<1x16x32xf32, #tpu.memory_space<vmem>>, %arg8: memref<1x8x32xf32, #tpu.memory_space<vmem>>, %arg9: memref<8x32xbf16, #tpu.memory_space<vmem>>) attributes {dimension_semantics = [#tpu.dimension_semantics<parallel>, #tpu.dimension_semantics<arbitrary>], iteration_bounds = array<i64: 2, 3>, scalar_prefetch = 0 : i64, scratch_operands = 1 : i64, tpu.core_type = #tpu.core_type<tc>, window_params = [{transform_indices = @transform_0, window_bounds = array<i64: 1, 8, 32>}, {transform_indices = @transform_1, window_bounds = array<i64: 1, 32, 96>}, {transform_indices = @transform_2, window_bounds = array<i64: 1, 32, 32>}, {transform_indices = @transform_3, window_bounds = array<i64: 1, 32, 32>}, {transform_indices = @transform_4, window_bounds = array<i64: 1, 32, 32>}, {transform_indices = @transform_5, window_bounds = array<i64: 1, 16, 32>}, {transform_indices = @transform_6, window_bounds = array<i64: 1, 8, 32>}]} {
    %c0_i32 = arith.constant 0 : i32
    %0 = arith.cmpi eq, %arg1, %c0_i32 : i32
    %1 = arith.extui %0 : i1 to i32
    %c0_i32_0 = arith.constant 0 : i32
    %2 = arith.cmpi ne, %1, %c0_i32_0 : i32
    scf.if %2 {
      %c0_58 = arith.constant 0 : index
      %c0_59 = arith.constant 0 : index
      %c0_60 = arith.constant 0 : index
      %177 = vector.load %arg2[%c0_58, %c0_59, %c0_60] : memref<1x8x32xf32, #tpu.memory_space<vmem>>, vector<1x8x32xf32>
      %c0_61 = arith.constant 0 : index
      %c0_62 = arith.constant 0 : index
      %c0_63 = arith.constant 0 : index
      %178 = vector.load %arg8[%c0_61, %c0_62, %c0_63] : memref<1x8x32xf32, #tpu.memory_space<vmem>>, vector<1x8x32xf32>
      tpu.vector_store %arg8[%c0_61, %c0_62, %c0_63], %177 {strides = array<i32>} : memref<1x8x32xf32, #tpu.memory_space<vmem>>, vector<1x8x32xf32>,
    } else {
    }
    %c0 = arith.constant 0 : index
    %c0_1 = arith.constant 0 : index
    %c0_2 = arith.constant 0 : index
    %3 = vector.load %arg7[%c0, %c0_1, %c0_2] : memref<1x16x32xf32, #tpu.memory_space<vmem>>, vector<1x16x32xf32>
    %4 = vector.shape_cast %3 : vector<1x16x32xf32> to vector<16x32xf32>
    %5 = vector.extract_strided_slice %4 {offsets = [0, 0], sizes = [1, 32], strides = [1, 1]} : vector<16x32xf32> to vector<1x32xf32>
    %6 = vector.extract_strided_slice %4 {offsets = [1, 0], sizes = [1, 32], strides = [1, 1]} : vector<16x32xf32> to vector<1x32xf32>
    %7 = vector.extract_strided_slice %4 {offsets = [2, 0], sizes = [1, 32], strides = [1, 1]} : vector<16x32xf32> to vector<1x32xf32>
    %8 = vector.extract_strided_slice %4 {offsets = [3, 0], sizes = [1, 32], strides = [1, 1]} : vector<16x32xf32> to vector<1x32xf32>
    %9 = vector.extract_strided_slice %4 {offsets = [4, 0], sizes = [1, 32], strides = [1, 1]} : vector<16x32xf32> to vector<1x32xf32>
    %10 = vector.extract_strided_slice %4 {offsets = [5, 0], sizes = [1, 32], strides = [1, 1]} : vector<16x32xf32> to vector<1x32xf32>
    %11 = vector.extract_strided_slice %4 {offsets = [6, 0], sizes = [1, 32], strides = [1, 1]} : vector<16x32xf32> to vector<1x32xf32>
    %12 = vector.extract_strided_slice %4 {offsets = [7, 0], sizes = [1, 32], strides = [1, 1]} : vector<16x32xf32> to vector<1x32xf32>
    %13 = vector.extract_strided_slice %4 {offsets = [8, 0], sizes = [1, 32], strides = [1, 1]} : vector<16x32xf32> to vector<1x32xf32>
    %14 = vector.extract_strided_slice %4 {offsets = [9, 0], sizes = [1, 32], strides = [1, 1]} : vector<16x32xf32> to vector<1x32xf32>
    %c0_3 = arith.constant 0 : index
    %c0_4 = arith.constant 0 : index
    %c0_5 = arith.constant 0 : index
    %15 = vector.load %arg8[%c0_3, %c0_4, %c0_5] : memref<1x8x32xf32, #tpu.memory_space<vmem>>, vector<1x8x32xf32>
    %16 = vector.shape_cast %15 : vector<1x8x32xf32> to vector<8x32xf32>
    %17 = arith.truncf %16 : vector<8x32xf32> to vector<8x32xbf16>
    %c0_6 = arith.constant 0 : index
    %c0_7 = arith.constant 0 : index
    %c0_8 = arith.constant 0 : index
    %18 = vector.load %arg3[%c0_6, %c0_7, %c0_8] : memref<1x32x96xbf16, #tpu.memory_space<vmem>>, vector<1x32x96xbf16>
    %19 = vector.shape_cast %18 : vector<1x32x96xbf16> to vector<32x96xbf16>
    %cst = arith.constant dense<0.000000e+00> : vector<8x96xf32>
    %20 = tpu.matmul %17, %19, %cst {dimension_numbers = #tpu.dot_dimension_numbers<[1], [0], [0], [1], [0, 0, 1, 1], [], []>} : vector<8x32xbf16>, vector<32x96xbf16>, vector<8x96xf32> -> vector<8x96xf32>
    %21 = vector.extract_strided_slice %20 {offsets = [0, 0], sizes = [8, 32], strides = [1, 1]} : vector<8x96xf32> to vector<8x32xf32>
    %22 = vector.broadcast %5 : vector<1x32xf32> to vector<8x32xf32>
    %23 = arith.addf %21, %22 : vector<8x32xf32>
    %24 = arith.truncf %23 : vector<8x32xf32> to vector<8x32xbf16>
    %25 = vector.extract_strided_slice %20 {offsets = [0, 32], sizes = [8, 32], strides = [1, 1]} : vector<8x96xf32> to vector<8x32xf32>
    %26 = vector.broadcast %6 : vector<1x32xf32> to vector<8x32xf32>
    %27 = arith.addf %25, %26 : vector<8x32xf32>
    %28 = arith.truncf %27 : vector<8x32xf32> to vector<8x32xbf16>
    %29 = vector.extract_strided_slice %20 {offsets = [0, 64], sizes = [8, 32], strides = [1, 1]} : vector<8x96xf32> to vector<8x32xf32>
    %30 = vector.broadcast %7 : vector<1x32xf32> to vector<8x32xf32>
    %31 = arith.addf %29, %30 : vector<8x32xf32>
    %32 = arith.truncf %31 : vector<8x32xf32> to vector<8x32xbf16>
    %33 = vector.extract_strided_slice %24 {offsets = [0, 0], sizes = [8, 8], strides = [1, 1]} : vector<8x32xbf16> to vector<8x8xbf16>
    %34 = vector.extract_strided_slice %28 {offsets = [0, 0], sizes = [8, 8], strides = [1, 1]} : vector<8x32xbf16> to vector<8x8xbf16>
    %35 = vector.extract_strided_slice %32 {offsets = [0, 0], sizes = [8, 8], strides = [1, 1]} : vector<8x32xbf16> to vector<8x8xbf16>
    %36 = tpu.transpose %34, [1, 0] : vector<8x8xbf16> -> vector<8x8xbf16>
    %cst_9 = arith.constant dense<0.000000e+00> : vector<8x8xf32>
    %37 = tpu.matmul %33, %36, %cst_9 {dimension_numbers = #tpu.dot_dimension_numbers<[1], [0], [0], [1], [0, 0, 1, 1], [], []>} : vector<8x8xbf16>, vector<8x8xbf16>, vector<8x8xf32> -> vector<8x8xf32>
    %cst_10 = arith.constant dense<0xFF800000> : vector<8xf32>
    %38 = vector.multi_reduction <maximumf>, %37, %cst_10 [1] : vector<8x8xf32> to vector<8xf32>
    %39 = vector.shape_cast %38 : vector<8xf32> to vector<8x1xf32>
    %40 = vector.broadcast %39 : vector<8x1xf32> to vector<8x8xf32>
    %41 = arith.subf %37, %40 : vector<8x8xf32>
    %42 = math.exp %41 : vector<8x8xf32>
    %cst_11 = arith.constant dense<0.000000e+00> : vector<8xf32>
    %43 = vector.multi_reduction <add>, %42, %cst_11 [1] : vector<8x8xf32> to vector<8xf32>
    %44 = vector.shape_cast %43 : vector<8xf32> to vector<8x1xf32>
    %45 = tpu.reciprocal %44 {approx = true} : vector<8x1xf32> -> vector<8x1xf32>
    %46 = vector.broadcast %45 : vector<8x1xf32> to vector<8x8xf32>
    %47 = arith.mulf %42, %46 : vector<8x8xf32>
    %48 = arith.truncf %47 : vector<8x8xf32> to vector<8x8xbf16>
    %cst_12 = arith.constant dense<0.000000e+00> : vector<8x8xf32>
    %49 = tpu.matmul %48, %35, %cst_12 {dimension_numbers = #tpu.dot_dimension_numbers<[1], [0], [0], [1], [0, 0, 1, 1], [], []>} : vector<8x8xbf16>, vector<8x8xbf16>, vector<8x8xf32> -> vector<8x8xf32>
    %50 = arith.truncf %49 : vector<8x8xf32> to vector<8x8xbf16>
    %c0_13 = arith.constant 0 : index
    %c0_14 = arith.constant 0 : index
    %51 = vector.load %arg9[%c0_13, %c0_14] : memref<8x32xbf16, #tpu.memory_space<vmem>>, vector<8x8xbf16>
    tpu.vector_store %arg9[%c0_13, %c0_14], %50 {strides = array<i32>} : memref<8x32xbf16, #tpu.memory_space<vmem>>, vector<8x8xbf16>,
    %52 = vector.extract_strided_slice %24 {offsets = [0, 8], sizes = [8, 8], strides = [1, 1]} : vector<8x32xbf16> to vector<8x8xbf16>
    %53 = vector.extract_strided_slice %28 {offsets = [0, 8], sizes = [8, 8], strides = [1, 1]} : vector<8x32xbf16> to vector<8x8xbf16>
    %54 = vector.extract_strided_slice %32 {offsets = [0, 8], sizes = [8, 8], strides = [1, 1]} : vector<8x32xbf16> to vector<8x8xbf16>
    %55 = tpu.transpose %53, [1, 0] : vector<8x8xbf16> -> vector<8x8xbf16>
    %cst_15 = arith.constant dense<0.000000e+00> : vector<8x8xf32>
    %56 = tpu.matmul %52, %55, %cst_15 {dimension_numbers = #tpu.dot_dimension_numbers<[1], [0], [0], [1], [0, 0, 1, 1], [], []>} : vector<8x8xbf16>, vector<8x8xbf16>, vector<8x8xf32> -> vector<8x8xf32>
    %cst_16 = arith.constant dense<0xFF800000> : vector<8xf32>
    %57 = vector.multi_reduction <maximumf>, %56, %cst_16 [1] : vector<8x8xf32> to vector<8xf32>
    %58 = vector.shape_cast %57 : vector<8xf32> to vector<8x1xf32>
    %59 = vector.broadcast %58 : vector<8x1xf32> to vector<8x8xf32>
    %60 = arith.subf %56, %59 : vector<8x8xf32>
    %61 = math.exp %60 : vector<8x8xf32>
    %cst_17 = arith.constant dense<0.000000e+00> : vector<8xf32>
    %62 = vector.multi_reduction <add>, %61, %cst_17 [1] : vector<8x8xf32> to vector<8xf32>
    %63 = vector.shape_cast %62 : vector<8xf32> to vector<8x1xf32>
    %64 = tpu.reciprocal %63 {approx = true} : vector<8x1xf32> -> vector<8x1xf32>
    %65 = vector.broadcast %64 : vector<8x1xf32> to vector<8x8xf32>
    %66 = arith.mulf %61, %65 : vector<8x8xf32>
    %67 = arith.truncf %66 : vector<8x8xf32> to vector<8x8xbf16>
    %cst_18 = arith.constant dense<0.000000e+00> : vector<8x8xf32>
    %68 = tpu.matmul %67, %54, %cst_18 {dimension_numbers = #tpu.dot_dimension_numbers<[1], [0], [0], [1], [0, 0, 1, 1], [], []>} : vector<8x8xbf16>, vector<8x8xbf16>, vector<8x8xf32> -> vector<8x8xf32>
    %69 = arith.truncf %68 : vector<8x8xf32> to vector<8x8xbf16>
    %c0_19 = arith.constant 0 : index
    %c8 = arith.constant 8 : index
    %70 = vector.load %arg9[%c0_19, %c8] : memref<8x32xbf16, #tpu.memory_space<vmem>>, vector<8x8xbf16>
    tpu.vector_store %arg9[%c0_19, %c8], %69 {strides = array<i32>} : memref<8x32xbf16, #tpu.memory_space<vmem>>, vector<8x8xbf16>,
    %71 = vector.extract_strided_slice %24 {offsets = [0, 16], sizes = [8, 8], strides = [1, 1]} : vector<8x32xbf16> to vector<8x8xbf16>
    %72 = vector.extract_strided_slice %28 {offsets = [0, 16], sizes = [8, 8], strides = [1, 1]} : vector<8x32xbf16> to vector<8x8xbf16>
    %73 = vector.extract_strided_slice %32 {offsets = [0, 16], sizes = [8, 8], strides = [1, 1]} : vector<8x32xbf16> to vector<8x8xbf16>
    %74 = tpu.transpose %72, [1, 0] : vector<8x8xbf16> -> vector<8x8xbf16>
    %cst_20 = arith.constant dense<0.000000e+00> : vector<8x8xf32>
    %75 = tpu.matmul %71, %74, %cst_20 {dimension_numbers = #tpu.dot_dimension_numbers<[1], [0], [0], [1], [0, 0, 1, 1], [], []>} : vector<8x8xbf16>, vector<8x8xbf16>, vector<8x8xf32> -> vector<8x8xf32>
    %cst_21 = arith.constant dense<0xFF800000> : vector<8xf32>
    %76 = vector.multi_reduction <maximumf>, %75, %cst_21 [1] : vector<8x8xf32> to vector<8xf32>
    %77 = vector.shape_cast %76 : vector<8xf32> to vector<8x1xf32>
    %78 = vector.broadcast %77 : vector<8x1xf32> to vector<8x8xf32>
    %79 = arith.subf %75, %78 : vector<8x8xf32>
    %80 = math.exp %79 : vector<8x8xf32>
    %cst_22 = arith.constant dense<0.000000e+00> : vector<8xf32>
    %81 = vector.multi_reduction <add>, %80, %cst_22 [1] : vector<8x8xf32> to vector<8xf32>
    %82 = vector.shape_cast %81 : vector<8xf32> to vector<8x1xf32>
    %83 = tpu.reciprocal %82 {approx = true} : vector<8x1xf32> -> vector<8x1xf32>
    %84 = vector.broadcast %83 : vector<8x1xf32> to vector<8x8xf32>
    %85 = arith.mulf %80, %84 : vector<8x8xf32>
    %86 = arith.truncf %85 : vector<8x8xf32> to vector<8x8xbf16>
    %cst_23 = arith.constant dense<0.000000e+00> : vector<8x8xf32>
    %87 = tpu.matmul %86, %73, %cst_23 {dimension_numbers = #tpu.dot_dimension_numbers<[1], [0], [0], [1], [0, 0, 1, 1], [], []>} : vector<8x8xbf16>, vector<8x8xbf16>, vector<8x8xf32> -> vector<8x8xf32>
    %88 = arith.truncf %87 : vector<8x8xf32> to vector<8x8xbf16>
    %c0_24 = arith.constant 0 : index
    %c16 = arith.constant 16 : index
    %89 = vector.load %arg9[%c0_24, %c16] : memref<8x32xbf16, #tpu.memory_space<vmem>>, vector<8x8xbf16>
    tpu.vector_store %arg9[%c0_24, %c16], %88 {strides = array<i32>} : memref<8x32xbf16, #tpu.memory_space<vmem>>, vector<8x8xbf16>,
    %90 = vector.extract_strided_slice %24 {offsets = [0, 24], sizes = [8, 8], strides = [1, 1]} : vector<8x32xbf16> to vector<8x8xbf16>
    %91 = vector.extract_strided_slice %28 {offsets = [0, 24], sizes = [8, 8], strides = [1, 1]} : vector<8x32xbf16> to vector<8x8xbf16>
    %92 = vector.extract_strided_slice %32 {offsets = [0, 24], sizes = [8, 8], strides = [1, 1]} : vector<8x32xbf16> to vector<8x8xbf16>
    %93 = tpu.transpose %91, [1, 0] : vector<8x8xbf16> -> vector<8x8xbf16>
    %cst_25 = arith.constant dense<0.000000e+00> : vector<8x8xf32>
    %94 = tpu.matmul %90, %93, %cst_25 {dimension_numbers = #tpu.dot_dimension_numbers<[1], [0], [0], [1], [0, 0, 1, 1], [], []>} : vector<8x8xbf16>, vector<8x8xbf16>, vector<8x8xf32> -> vector<8x8xf32>
    %cst_26 = arith.constant dense<0xFF800000> : vector<8xf32>
    %95 = vector.multi_reduction <maximumf>, %94, %cst_26 [1] : vector<8x8xf32> to vector<8xf32>
    %96 = vector.shape_cast %95 : vector<8xf32> to vector<8x1xf32>
    %97 = vector.broadcast %96 : vector<8x1xf32> to vector<8x8xf32>
    %98 = arith.subf %94, %97 : vector<8x8xf32>
    %99 = math.exp %98 : vector<8x8xf32>
    %cst_27 = arith.constant dense<0.000000e+00> : vector<8xf32>
    %100 = vector.multi_reduction <add>, %99, %cst_27 [1] : vector<8x8xf32> to vector<8xf32>
    %101 = vector.shape_cast %100 : vector<8xf32> to vector<8x1xf32>
    %102 = tpu.reciprocal %101 {approx = true} : vector<8x1xf32> -> vector<8x1xf32>
    %103 = vector.broadcast %102 : vector<8x1xf32> to vector<8x8xf32>
    %104 = arith.mulf %99, %103 : vector<8x8xf32>
    %105 = arith.truncf %104 : vector<8x8xf32> to vector<8x8xbf16>
    %cst_28 = arith.constant dense<0.000000e+00> : vector<8x8xf32>
    %106 = tpu.matmul %105, %92, %cst_28 {dimension_numbers = #tpu.dot_dimension_numbers<[1], [0], [0], [1], [0, 0, 1, 1], [], []>} : vector<8x8xbf16>, vector<8x8xbf16>, vector<8x8xf32> -> vector<8x8xf32>
    %107 = arith.truncf %106 : vector<8x8xf32> to vector<8x8xbf16>
    %c0_29 = arith.constant 0 : index
    %c24 = arith.constant 24 : index
    %108 = vector.load %arg9[%c0_29, %c24] : memref<8x32xbf16, #tpu.memory_space<vmem>>, vector<8x8xbf16>
    tpu.vector_store %arg9[%c0_29, %c24], %107 {strides = array<i32>} : memref<8x32xbf16, #tpu.memory_space<vmem>>, vector<8x8xbf16>,
    %c0_30 = arith.constant 0 : index
    %c0_31 = arith.constant 0 : index
    %109 = vector.load %arg9[%c0_30, %c0_31] : memref<8x32xbf16, #tpu.memory_space<vmem>>, vector<8x32xbf16>
    %c0_32 = arith.constant 0 : index
    %c0_33 = arith.constant 0 : index
    %c0_34 = arith.constant 0 : index
    %110 = vector.load %arg4[%c0_32, %c0_33, %c0_34] : memref<1x32x32xbf16, #tpu.memory_space<vmem>>, vector<1x32x32xbf16>
    %111 = vector.shape_cast %110 : vector<1x32x32xbf16> to vector<32x32xbf16>
    %cst_35 = arith.constant dense<0.000000e+00> : vector<8x32xf32>
    %112 = tpu.matmul %109, %111, %cst_35 {dimension_numbers = #tpu.dot_dimension_numbers<[1], [0], [0], [1], [0, 0, 1, 1], [], []>} : vector<8x32xbf16>, vector<32x32xbf16>, vector<8x32xf32> -> vector<8x32xf32>
    %113 = vector.broadcast %8 : vector<1x32xf32> to vector<8x32xf32>
    %114 = arith.addf %112, %113 : vector<8x32xf32>
    %115 = arith.addf %16, %114 : vector<8x32xf32>
    %cst_36 = arith.constant dense<0.000000e+00> : vector<8xf32>
    %116 = vector.multi_reduction <add>, %115, %cst_36 [1] : vector<8x32xf32> to vector<8xf32>
    %117 = vector.shape_cast %116 : vector<8xf32> to vector<8x1xf32>
    %cst_37 = arith.constant 3.200000e+01 : f32
    %118 = vector.broadcast %cst_37 : f32 to vector<8x1xf32>
    %119 = arith.divf %117, %118 : vector<8x1xf32>
    %120 = vector.broadcast %119 : vector<8x1xf32> to vector<8x32xf32>
    %121 = arith.subf %115, %120 : vector<8x32xf32>
    %122 = arith.mulf %121, %121 : vector<8x32xf32>
    %cst_38 = arith.constant dense<0.000000e+00> : vector<8xf32>
    %123 = vector.multi_reduction <add>, %122, %cst_38 [1] : vector<8x32xf32> to vector<8xf32>
    %124 = vector.shape_cast %123 : vector<8xf32> to vector<8x1xf32>
    %cst_39 = arith.constant 3.200000e+01 : f32
    %125 = vector.broadcast %cst_39 : f32 to vector<8x1xf32>
    %126 = arith.divf %124, %125 : vector<8x1xf32>
    %127 = vector.broadcast %119 : vector<8x1xf32> to vector<8x32xf32>
    %128 = arith.subf %115, %127 : vector<8x32xf32>
    %cst_40 = arith.constant 9.99999996E-13 : f32
    %129 = vector.broadcast %cst_40 : f32 to vector<8x1xf32>
    %130 = arith.addf %126, %129 : vector<8x1xf32>
    %131 = math.rsqrt %130 : vector<8x1xf32>
    %132 = vector.broadcast %131 : vector<8x1xf32> to vector<8x32xf32>
    %133 = arith.mulf %128, %132 : vector<8x32xf32>
    %134 = vector.broadcast %9 : vector<1x32xf32> to vector<8x32xf32>
    %135 = arith.mulf %133, %134 : vector<8x32xf32>
    %136 = vector.broadcast %10 : vector<1x32xf32> to vector<8x32xf32>
    %137 = arith.addf %135, %136 : vector<8x32xf32>
    %138 = arith.truncf %137 : vector<8x32xf32> to vector<8x32xbf16>
    %c0_41 = arith.constant 0 : index
    %c0_42 = arith.constant 0 : index
    %c0_43 = arith.constant 0 : index
    %139 = vector.load %arg5[%c0_41, %c0_42, %c0_43] : memref<1x32x32xbf16, #tpu.memory_space<vmem>>, vector<1x32x32xbf16>
    %140 = vector.shape_cast %139 : vector<1x32x32xbf16> to vector<32x32xbf16>
    %cst_44 = arith.constant dense<0.000000e+00> : vector<8x32xf32>
    %141 = tpu.matmul %138, %140, %cst_44 {dimension_numbers = #tpu.dot_dimension_numbers<[1], [0], [0], [1], [0, 0, 1, 1], [], []>} : vector<8x32xbf16>, vector<32x32xbf16>, vector<8x32xf32> -> vector<8x32xf32>
    %142 = vector.broadcast %11 : vector<1x32xf32> to vector<8x32xf32>
    %143 = arith.addf %141, %142 : vector<8x32xf32>
    %cst_45 = arith.constant 0.000000e+00 : f32
    %144 = vector.broadcast %cst_45 : f32 to vector<8x32xf32>
    %145 = arith.maximumf %143, %144 : vector<8x32xf32>
    %146 = arith.truncf %145 : vector<8x32xf32> to vector<8x32xbf16>
    %c0_46 = arith.constant 0 : index
    %c0_47 = arith.constant 0 : index
    %c0_48 = arith.constant 0 : index
    %147 = vector.load %arg6[%c0_46, %c0_47, %c0_48] : memref<1x32x32xbf16, #tpu.memory_space<vmem>>, vector<1x32x32xbf16>
    %148 = vector.shape_cast %147 : vector<1x32x32xbf16> to vector<32x32xbf16>
    %cst_49 = arith.constant dense<0.000000e+00> : vector<8x32xf32>
    %149 = tpu.matmul %146, %148, %cst_49 {dimension_numbers = #tpu.dot_dimension_numbers<[1], [0], [0], [1], [0, 0, 1, 1], [], []>} : vector<8x32xbf16>, vector<32x32xbf16>, vector<8x32xf32> -> vector<8x32xf32>
    %150 = vector.broadcast %12 : vector<1x32xf32> to vector<8x32xf32>
    %151 = arith.addf %149, %150 : vector<8x32xf32>
    %152 = arith.addf %137, %151 : vector<8x32xf32>
    %cst_50 = arith.constant dense<0.000000e+00> : vector<8xf32>
    %153 = vector.multi_reduction <add>, %152, %cst_50 [1] : vector<8x32xf32> to vector<8xf32>
    %154 = vector.shape_cast %153 : vector<8xf32> to vector<8x1xf32>
    %cst_51 = arith.constant 3.200000e+01 : f32
    %155 = vector.broadcast %cst_51 : f32 to vector<8x1xf32>
    %156 = arith.divf %154, %155 : vector<8x1xf32>
    %157 = vector.broadcast %156 : vector<8x1xf32> to vector<8x32xf32>
    %158 = arith.subf %152, %157 : vector<8x32xf32>
    %159 = arith.mulf %158, %158 : vector<8x32xf32>
    %cst_52 = arith.constant dense<0.000000e+00> : vector<8xf32>
    %160 = vector.multi_reduction <add>, %159, %cst_52 [1] : vector<8x32xf32> to vector<8xf32>
    %161 = vector.shape_cast %160 : vector<8xf32> to vector<8x1xf32>
    %cst_53 = arith.constant 3.200000e+01 : f32
    %162 = vector.broadcast %cst_53 : f32 to vector<8x1xf32>
    %163 = arith.divf %161, %162 : vector<8x1xf32>
    %164 = vector.broadcast %156 : vector<8x1xf32> to vector<8x32xf32>
    %165 = arith.subf %152, %164 : vector<8x32xf32>
    %cst_54 = arith.constant 9.99999996E-13 : f32
    %166 = vector.broadcast %cst_54 : f32 to vector<8x1xf32>
    %167 = arith.addf %163, %166 : vector<8x1xf32>
    %168 = math.rsqrt %167 : vector<8x1xf32>
    %169 = vector.broadcast %168 : vector<8x1xf32> to vector<8x32xf32>
    %170 = arith.mulf %165, %169 : vector<8x32xf32>
    %171 = vector.broadcast %13 : vector<1x32xf32> to vector<8x32xf32>
    %172 = arith.mulf %170, %171 : vector<8x32xf32>
    %173 = vector.broadcast %14 : vector<1x32xf32> to vector<8x32xf32>
    %174 = arith.addf %172, %173 : vector<8x32xf32>
    %175 = vector.shape_cast %174 : vector<8x32xf32> to vector<1x8x32xf32>
    %c0_55 = arith.constant 0 : index
    %c0_56 = arith.constant 0 : index
    %c0_57 = arith.constant 0 : index
    %176 = vector.load %arg8[%c0_55, %c0_56, %c0_57] : memref<1x8x32xf32, #tpu.memory_space<vmem>>, vector<1x8x32xf32>
    tpu.vector_store %arg8[%c0_55, %c0_56, %c0_57], %175 {strides = array<i32>} : memref<1x8x32xf32, #tpu.memory_space<vmem>>, vector<1x8x32xf32>,
    return
  }
  func.func @transform_0(%arg0: i32, %arg1: i32) -> (i32, i32, i32) {
    %c0_i32 = arith.constant 0 : i32
    %c0_i32_0 = arith.constant 0 : i32
    %c0_i32_1 = arith.constant 0 : i32
    return %arg0, %c0_i32, %c0_i32_0 : i32, i32, i32
  }
  func.func @transform_1(%arg0: i32, %arg1: i32) -> (i32, i32, i32) {
    %c0_i32 = arith.constant 0 : i32
    %c0_i32_0 = arith.constant 0 : i32
    %c0_i32_1 = arith.constant 0 : i32
    return %arg1, %c0_i32, %c0_i32_0 : i32, i32, i32
  }
  func.func @transform_2(%arg0: i32, %arg1: i32) -> (i32, i32, i32) {
    %c0_i32 = arith.constant 0 : i32
    %c0_i32_0 = arith.constant 0 : i32
    %c0_i32_1 = arith.constant 0 : i32
    return %arg1, %c0_i32, %c0_i32_0 : i32, i32, i32
  }
  func.func @transform_3(%arg0: i32, %arg1: i32) -> (i32, i32, i32) {
    %c0_i32 = arith.constant 0 : i32
    %c0_i32_0 = arith.constant 0 : i32
    %c0_i32_1 = arith.constant 0 : i32
    return %arg1, %c0_i32, %c0_i32_0 : i32, i32, i32
  }
  func.func @transform_4(%arg0: i32, %arg1: i32) -> (i32, i32, i32) {
    %c0_i32 = arith.constant 0 : i32
    %c0_i32_0 = arith.constant 0 : i32
    %c0_i32_1 = arith.constant 0 : i32
    return %arg1, %c0_i32, %c0_i32_0 : i32, i32, i32
  }
  func.func @transform_5(%arg0: i32, %arg1: i32) -> (i32, i32, i32) {
    %c0_i32 = arith.constant 0 : i32
    %c0_i32_0 = arith.constant 0 : i32
    %c0_i32_1 = arith.constant 0 : i32
    return %arg1, %c0_i32, %c0_i32_0 : i32, i32, i32
  }
  func.func @transform_6(%arg0: i32, %arg1: i32) -> (i32, i32, i32) {
    %c0_i32 = arith.constant 0 : i32
    %c0_i32_0 = arith.constant 0 : i32
    %c0_i32_1 = arith.constant 0 : i32
    return %arg0, %c0_i32, %c0_i32_0 : i32, i32, i32
  }
}

</mosaic_0001>

<bundles_post_ra>
// kernel: tpu_custom_call.1
= control target key start
LH: loop header
LB: loop body
LE: loop exit
PB: predicated region body
PF: predicated region fallthrough
CT: control target
= control target key end

     0   :  { %s2830_s0 = inlined_call_operand.hbm [shape: f32[2,8,32], index: 0, kind: input, shape index: {}]   ;;  %s2831_s1 = inlined_call_operand.hbm [shape: bf16[3,32,96], index: 1, kind: input, shape index: {}]   ;;  %s2832_s2 = inlined_call_operand.hbm [shape: bf16[3,32,32], index: 2, kind: input, shape index: {}]   ;;  %s2833_s3 = inlined_call_operand.hbm [shape: bf16[3,32,32], index: 3, kind: input, shape index: {}]   ;;  %s2834_s4 = inlined_call_operand.hbm [shape: bf16[3,32,32], index: 4, kind: input, shape index: {}]   ;;  %s2835_s5 = inlined_call_operand.hbm [shape: f32[3,16,32], index: 5, kind: input, shape index: {}]   ;;  %s2836_s6 = inlined_call_operand.hbm [shape: f32[2,8,32], index: 6, kind: output, shape index: {}]  }
   0x1   :  { %2863 = sst [smem:[#allocation34_spill]] %s2831_s1 }
   0x2   :  { %2864 = sst [smem:[#allocation35_spill]] %s2833_s3 }
   0x3   :  { %2865 = sst [smem:[#allocation36_spill]] %s2836_s6 }
   0x4   :  { %11 = vsyncpa [#allocation4], 0 }
   0x5   :  { %13 = vsyncpa [#allocation4 + $0x1], 0 }
   0x6   :  { %14 = vsyncpa [#allocation7], 0 }
   0x7   :  { %16 = vsyncpa [#allocation7 + $0x1], 0 }
   0x8   :  { %17 = vsyncpa [#allocation10], 0 }
   0x9   :  { %19 = vsyncpa [#allocation10 + $0x1], 0 }
   0xa   :  { %20 = vsyncpa [#allocation13], 0 }
   0xb   :  { %22 = vsyncpa [#allocation13 + $0x1], 0 }
   0xc   :  { %23 = vsyncpa [#allocation5], 0 }
   0xd   :  { %25 = vsyncpa [#allocation5 + $0x1], 0  ;;  %s2219_s21 = smov 0   ;;  %s2221_s22 = smov 0  }
   0xe   :  { %s2223_s23 = smov 0   ;;  %s2225_s24 = smov 0  }
   0xf   :  { %s2227_s25 = smov 0   ;;  %s2229_s26 = smov 0  }
  0x10   :  { %s2231_s27 = smov 0   ;;  %s2233_s28 = smov 0  }
  0x11   :  { %s2235_s29 = smov 0   ;;  %s2237_s30 = smov 0  }
  0x12   :  { %s2239_s7 = smov 0  }
  0x13 LB: > { %2866 = sst [smem:[#allocation20_spill]] %s2118_s22  ;;  %p2841_p0 = scmp.eq.s32.totalorder %s2154_s7, 0  ;;  %s2154_s7 = sphi %s2239_s7, %s31_s7   ;;  %s2150_s30 = sphi %s2237_s30, %s2926_s30   ;;  %s2146_s29 = sphi %s2235_s29, %s2919_s29   ;;  %s2142_s28 = sphi %s2233_s28, %s2918_s28   ;;  %s2138_s27 = sphi %s2231_s27, %s2925_s27   ;;  %s2134_s26 = sphi %s2229_s26, %s2916_s26   ;;  %s2130_s25 = sphi %s2227_s25, %s2924_s25   ;;  %s2126_s24 = sphi %s2225_s24, %s2923_s24   ;;  %s2122_s23 = sphi %s2223_s23, %s2922_s23   ;;  %s2118_s22 = sphi %s2221_s22, %s2921_s22   ;;  %s2114_s21 = sphi %s2219_s21, %s2913_s21  }
  0x14   : > { %2867 = sst [smem:[#allocation21_spill]] %s2134_s26  ;;  %p83_p1 = scmp.ne.s32.totalorder %s2122_s23, %s2118_s22 }
  0x15   : > { %2868 = sst [smem:[#allocation22_spill]] %s2138_s27  ;;  %p2840_p2 = scmp.lt.s32.totalorder %s2154_s7, 6 }
  0x16   : > { %2869 = sst [smem:[#allocation23_spill]] %s2142_s28  ;;  %s2839_s9 = sand.u32 1, %s2154_s7  }
  0x17   : > { %2870 = sst [smem:[#allocation24_spill]] %s2146_s29  ;;  %p85_p3 = por %p83_p1, %p2841_p0 }
  0x18   : > { %2871 = sst [smem:[#allocation25_spill]] %s2150_s30  ;;  %s2837_s10 = sand.u32 1, %s2122_s23  }
  0x19   : > { %s2284_s11 = sshll.u32 %s2146_s29, 8  ;;  %s2288_s12 = sshll.u32 %s2837_s10, 4 }
  0x1a   : > { %s2872_s1 = sld [smem:[#allocation34_spill]]  ;;  %p2298_p4 = pnand %p2840_p2, %p85_p3 }
  0x1b   : > { %s265_s17 = scalar_lea.vmem [#allocation6], %s2288_s12  ;;  %s2308_s19 = scalar_lea.sflag [#allocation7], %s2839_s9 }
  0x1c   : > { %s2873_s16 = scalar_select %p2298_p4, 1, 0 }
  0x1d   : > { %s272_s18 = sshll.u32 %s265_s17, 4  ;;  %p2314_p7 = pneg %p2298_p4  ;;  %s2303_s18 = int_to_ptr.vmem [resolvable:$true] %s272_s18 }
  0x20   : > { %s2294_s15 = scalar_lea.hbm %s2872_s1, %s2284_s11  ;;  %s1845_s17 = scalar_lea.hbm %s2872_s1, 768 }
  0x21   : > { %s1840_s20 = scalar_lea.hbm %s2294_s15, 256  ;;  %p1846_p10 = scmp.lt.u32.totalorder %s2294_s15, %s2872_s1 }
  0x22   : > { %p1841_p6 = scmp.ne.s32.totalorder %s2294_s15, %s1840_s20  ;;  %p1847_p11 = scmp.lt.u32.totalorder %s1845_s17, %s1840_s20 }
  0x23   : > { %p1849_p13 = scmp.lt.u32.totalorder %s1840_s20, %s2294_s15 }
  0x24   : > { %p1843_p8 = pnand %p2314_p7, %p1841_p6  ;;  %p1848_p12 = por %p1847_p11, %p1846_p10 }
  0x26   : > { %p1844_p9 = pneg %p1843_p8  ;;  %p1850_p1 = por %p1849_p13, %p1848_p12 }
  0x28   : > { %p1851_p3 = pnand %p1850_p1, %p1844_p9 }
  0x2a   : > { %1854 = shalt.err (!%p1851_p3)
}
  0x2b   : > { %s1855_s9 = scalar_lea.vmem %s2303_s18, 256  ;;  %s2156_s10 = smov [#allocation6]  }
  0x2c   : > { %p1856_p6 = scmp.ne.s32.totalorder %s2303_s18, %s1855_s9  ;;  %s1860_s14 = sshll.u32 %s2156_s10, 4  ;;  %s1861_s14 = int_to_ptr.vmem [resolvable:$false] %s1860_s14 }
  0x2d   : > { %s1862_s6 = scalar_lea.vmem %s1861_s14, 512  ;;  %p1863_p0 = scmp.lt.s32.totalorder %s2303_s18, %s1861_s14 }
  0x2e   : > { %p1858_p8 = pnand %p1856_p6, %p2314_p7  ;;  %p1864_p5 = scmp.lt.s32.totalorder %s1862_s6, %s1855_s9 }
  0x30   : > { %p1859_p2 = pneg %p1858_p8  ;;  %p1865_p10 = por %p1864_p5, %p1863_p0 }
  0x32   : > { %p1866_p11 = pnand %p1865_p10, %p1859_p2 }
  0x34   : > { %1869 = shalt.err (!%p1866_p11)
}
  0x35   : > { %s2842_s8 = smov 64   ;;  %s2844_s20 = smov 4  }
  0x36   : > { %1684 = dma.hbm_to_vmem [thread:$0]  (!%p2298_p4), %s2294_s15, 256, %s2303_s18, %s2308_s19, %s2842_s8, %s2842_s8, %s2844_s20  }
  0x37   : > { %p364_p0 = scmp.lt.s32.totalorder %s2154_s7, 7  ;;  %s2875_s3 = sld [smem:[#allocation35_spill]] }
  0x38   : > { %p2876_p2 = scmp.ge.s32.totalorder %s2154_s7, 1  ;;  %s307_s6 = scalar_lea.vmem [#allocation9], %s2288_s12 }
  0x39   : > { %s314_s1 = sshll.u32 %s307_s6, 4  ;;  %s2879_s15 = sand.u32 1, %s2154_s7   ;;  %s2355_s1 = int_to_ptr.vmem [resolvable:$true] %s314_s1 }
  0x3a   : > { %p2350_p5 = pnand %p2876_p2, %p364_p0  ;;  %s2359_s18 = scalar_lea.sflag [#allocation10], %s2879_s15 }
  0x3c   : > { %s2877_s14 = scalar_select %p2350_p5, 1, 0 }
  0x3d   : > { %s2346_s10 = scalar_lea.hbm %s2875_s3, %s2284_s11  ;;  %s1875_s20 = scalar_lea.hbm %s2875_s3, 768 }
  0x3e   : > { %2878 = sst [smem:[#allocation26_spill]] %s2877_s14  ;;  %s1870_s8 = scalar_lea.hbm %s2346_s10, 256 }
  0x3f   : > { %p1871_p9 = scmp.ne.s32.totalorder %s2346_s10, %s1870_s8  ;;  %p1876_p1 = scmp.lt.u32.totalorder %s2346_s10, %s2875_s3 }
  0x40   : > { %p1877_p3 = scmp.lt.u32.totalorder %s1875_s20, %s1870_s8  ;;  %p1879_p8 = scmp.lt.u32.totalorder %s1870_s8, %s2346_s10 }
  0x41   : > { %p1873_p12 = pnand %p1871_p9, %p2314_p7 }
  0x42   : > { %p1878_p6 = por %p1877_p3, %p1876_p1 }
  0x43   : > { %p1874_p13 = pneg %p1873_p12 }
  0x44   : > { %p1880_p10 = por %p1879_p8, %p1878_p6 }
  0x46   : > { %p1881_p11 = pnand %p1880_p10, %p1874_p13 }
  0x48   : > { %1884 = shalt.err (!%p1881_p11)
}
  0x49   : > { %s1885_s6 = scalar_lea.vmem %s2355_s1, 256  ;;  %s2159_s15 = smov [#allocation9]  }
  0x4a   : > { %p1886_p0 = scmp.ne.s32.totalorder %s2355_s1, %s1885_s6  ;;  %s1890_s9 = sshll.u32 %s2159_s15, 4  ;;  %s1891_s9 = int_to_ptr.vmem [resolvable:$false] %s1890_s9 }
  0x4b   : > { %s1892_s27 = scalar_lea.vmem %s1891_s9, 512  ;;  %p1893_p12 = scmp.lt.s32.totalorder %s2355_s1, %s1891_s9 }
  0x4c   : > { %p1888_p2 = pnand %p1886_p0, %p2314_p7  ;;  %p1894_p5 = scmp.lt.s32.totalorder %s1892_s27, %s1885_s6 }
  0x4e   : > { %p1889_p9 = pneg %p1888_p2  ;;  %p1895_p1 = por %p1894_p5, %p1893_p12 }
  0x50   : > { %p1896_p3 = pnand %p1895_p1, %p1889_p9 }
  0x52   : > { %1899 = shalt.err (!%p1896_p3)
}
  0x53   : > { %s2880_s28 = smov 4   ;;  %s2881_s8 = smov 64  }
  0x54   : > { %1690 = dma.hbm_to_vmem [thread:$0]  (!%p2298_p4), %s2346_s10, 256, %s2355_s1, %s2359_s18, %s2881_s8, %s2881_s8, %s2880_s28  }
  0x55   : > { %s2387_s20 = sadd.s32 4294967295, %s2154_s7   ;;  %s1492_s17 = sadd.s32 4294967294, %s2154_s7  }
  0x56   : > { %2882 = sst [smem:[#allocation27_spill]] %s2387_s20  ;;  %s40_s6 = sadd.s32 1, %s2146_s29 }
  0x57   : > { %p41_p5 = scmp.ge.s32.totalorder %s40_s6, 3  ;;  %s43_s15 = sadd.s32 1, %s2150_s30 }
  0x58   : > { %s50_s9 = sadd.s32 1, %s2134_s26  ;;  %p57_p13 = scmp.ne.s32.totalorder %s2134_s26, %s2130_s25 }
  0x59   : > { %s2928_s6 = smov (%p41_p5, %s40_s6), 0  ;;  %s2930_s15 = smov (!%p41_p5, %s43_s15), %s2150_s30 }
  0x5a   : > { %2883 = sst [smem:[#allocation28_spill]] %s2928_s6  ;;  %p2884_p6 = scmp.eq.s32.totalorder %s2154_s7, 0 }
  0x5b   : > { %p63_p10 = scmp.ne.s32.totalorder %s2130_s25, %s2126_s24  ;;  %p45_p11 = scmp.ge.s32.totalorder %s2930_s15, 2 }
  0x5c   : > { %p2403_p8 = por %p2884_p6, %p57_p13  ;;  %p64_p0 = scmp.eq.s32.totalorder %s2387_s20, 0 }
  0x5d   : > { %s73_s10 = ssub.s32 %s2146_s29, %s2928_s6  ;;  %p89_p2 = scmp.ne.s32.totalorder %s2118_s22, %s2114_s21 }
  0x5e   : > { %s2932_s15 = smov (%p45_p11, %s2930_s15), 0  ;;  %p2419_p9 = por %p64_p0, %p63_p10 }
  0x5f   : > { %2886 = sst [smem:[#allocation29_spill]] %s2932_s15  ;;  %p74_p12 = scmp.eq.s32.totalorder %s73_s10, 0 }
  0x60   : > { %s2887_s27 = scalar_select %p2419_p9, 1, 0 }
  0x61   : > { %s47_s3 = ssub.s32 %s2150_s30, %s2932_s15  ;;  %p2425_p1 = por %p89_p2, %p64_p0 }
  0x62   : > { %2888 = sst [smem:[#allocation30_spill]] %s2887_s27  ;;  %p48_p3 = scmp.eq.s32.totalorder %s47_s3, 0 }
  0x63   : > { %s2889_s14 = scalar_select %p2425_p1, 1, 0 }
  0x64   : > { %p217_p5 = scmp.eq.s32.totalorder %s2387_s20, 5  ;;  %s2891_s6 = sadd.s32 1, %s2122_s23 }
  0x65   : > { %2890 = sst [smem:[#allocation31_spill]] %s2889_s14  ;;  %p223_p11 = scmp.eq.s32.totalorder %s1492_s17, 5 }
  0x66   : > { %s2433_s21 = scalar_select %p74_p12, %s2122_s23, %s2891_s6  }
  0x67   : > { %s2436_s29 = scalar_select %p48_p3, %s2134_s26, %s50_s9  }
  0x68   : > { %2892 = sst [smem:[#allocation32_spill]] %s2433_s21  ;;  %p2441_p6 = por %p217_p5, %p57_p13 }
  0x69   : > { %2893 = sst [smem:[#allocation33_spill]] %s2436_s29  ;;  %s243_s27 = sand.u32 1, %s2134_s26  }
  0x6a   : > { %s2894_s22 = scalar_select %p2441_p6, 1, 0 }
  0x6b   : > { %s1496_s10 = sshll.u32 %s2150_s30, 7  ;;  %p2450_p0 = por %p223_p11, %p63_p10 }
  0x6c   : > { %s1495_s3 = sshll.u32 %s243_s27, 3  ;;  %s2457_s6 = scalar_lea.hbm %s2830_s0, %s1496_s10 }
  0x6d   : > { %s2895_s15 = scalar_select %p2450_p0, 1, 0 }
  0x6e   : > { %p2896_p2 = scmp.lt.s32.totalorder %s2154_s7, 6  ;;  %s247_s9 = scalar_lea.vmem [#allocation3], %s1495_s3 }
  0x6f   : > { %s254_s30 = sshll.u32 %s247_s9, 4  ;;  %s244_s29 = scalar_lea.sflag [#allocation4], %s243_s27  ;;  %s2467_s30 = int_to_ptr.vmem [resolvable:$true] %s254_s30 }
  0x70   : > { %p2463_p13 = pnand %p2896_p2, %p2403_p8  ;;  %s1900_s14 = scalar_lea.hbm %s2457_s6, 128 }
  0x71   : > { %p1901_p10 = scmp.ne.s32.totalorder %s2457_s6, %s1900_s14  ;;  %s1905_s10 = scalar_lea.hbm %s2830_s0, 256 }
  0x72   : > { %p1902_p12 = pneg %p2463_p13  ;;  %p1906_p8 = scmp.lt.u32.totalorder %s2457_s6, %s2830_s0 }
  0x73   : > { %p1907_p11 = scmp.lt.u32.totalorder %s1905_s10, %s1900_s14  ;;  %p1909_p0 = scmp.lt.u32.totalorder %s1900_s14, %s2457_s6 }
  0x74   : > { %p1903_p3 = pnand %p1902_p12, %p1901_p10 }
  0x75   : > { %p1908_p2 = por %p1907_p11, %p1906_p8 }
  0x76   : > { %p1904_p5 = pneg %p1903_p3 }
  0x77   : > { %p1910_p6 = por %p1909_p0, %p1908_p2 }
  0x79   : > { %p1911_p1 = pnand %p1910_p6, %p1904_p5 }
  0x7b   : > { %1914 = shalt.err (!%p1911_p1)
}
  0x7c   : > { %s1915_s27 = scalar_lea.vmem %s2467_s30, 128  ;;  %s2160_s3 = smov [#allocation3]  }
  0x7d   : > { %p1916_p10 = scmp.ne.s32.totalorder %s2467_s30, %s1915_s27  ;;  %s1920_s9 = sshll.u32 %s2160_s3, 4  ;;  %s1921_s9 = int_to_ptr.vmem [resolvable:$false] %s1920_s9 }
  0x7e   : > { %s1922_s26 = scalar_lea.vmem %s1921_s9, 256  ;;  %p1923_p4 = scmp.lt.s32.totalorder %s2467_s30, %s1921_s9 }
  0x7f   : > { %p1918_p3 = pnand %p1916_p10, %p1902_p12  ;;  %p1924_p8 = scmp.lt.s32.totalorder %s1922_s26, %s1915_s27 }
  0x81   : > { %p1919_p9 = pneg %p1918_p3  ;;  %p1925_p11 = por %p1924_p8, %p1923_p4 }
  0x83   : > { %p1926_p0 = pnand %p1925_p11, %p1919_p9 }
  0x85   : > { %1929 = shalt.err (!%p1926_p0)
}
  0x86   : > { %1681 = dma.hbm_to_vmem [thread:$0]  (!%p2463_p13), %s2457_s6, 128, %s2467_s30, %s244_s29  }
  0x87   : > { %s2498_s20 = scalar_lea.hbm %s2832_s2, %s2284_s11  ;;  %s286_s1 = scalar_lea.vmem [#allocation8], %s2288_s12 }
  0x88   : > { %s293_s10 = sshll.u32 %s286_s1, 4  ;;  %s1930_s17 = scalar_lea.hbm %s2498_s20, 256  ;;  %s2501_s10 = int_to_ptr.vmem [resolvable:$true] %s293_s10 }
  0x89   : > { %p1931_p4 = scmp.ne.s32.totalorder %s2498_s20, %s1930_s17  ;;  %s1935_s30 = scalar_lea.hbm %s2832_s2, 768 }
  0x8a   : > { %p1936_p6 = scmp.lt.u32.totalorder %s2498_s20, %s2832_s2  ;;  %p1937_p13 = scmp.lt.u32.totalorder %s1935_s30, %s1930_s17 }
  0x8b   : > { %p1933_p9 = pnand %p1931_p4, %p2314_p7  ;;  %p1939_p5 = scmp.lt.u32.totalorder %s1930_s17, %s2498_s20 }
  0x8c   : > { %p1938_p12 = por %p1937_p13, %p1936_p6 }
  0x8d   : > { %p1934_p1 = pneg %p1933_p9 }
  0x8e   : > { %p1940_p2 = por %p1939_p5, %p1938_p12 }
  0x90   : > { %p1941_p10 = pnand %p1940_p2, %p1934_p1 }
  0x92   : > { %1944 = shalt.err (!%p1941_p10)
}
  0x93   : > { %s1945_s9 = scalar_lea.vmem %s2501_s10, 256  ;;  %s2161_s26 = smov [#allocation8]  }
  0x94   : > { %p1946_p3 = scmp.ne.s32.totalorder %s2501_s10, %s1945_s9  ;;  %s1950_s21 = sshll.u32 %s2161_s26, 4  ;;  %s1951_s21 = int_to_ptr.vmem [resolvable:$false] %s1950_s21 }
  0x95   : > { %s1952_s14 = scalar_lea.vmem %s1951_s21, 512  ;;  %p1953_p0 = scmp.lt.s32.totalorder %s2501_s10, %s1951_s21 }
  0x96   : > { %p1948_p8 = pnand %p1946_p3, %p2314_p7  ;;  %p1954_p4 = scmp.lt.s32.totalorder %s1952_s14, %s1945_s9 }
  0x98   : > { %p1949_p11 = pneg %p1948_p8  ;;  %p1955_p9 = por %p1954_p4, %p1953_p0 }
  0x9a   : > { %p1956_p6 = pnand %p1955_p9, %p1949_p11 }
  0x9c   : > { %1959 = shalt.err (!%p1956_p6)
}
  0x9d   : > { %p2898_p1 = scmp.ne.s32.totalorder %s2873_s16, 0  ;;  %s2532_s27 = scalar_lea.hbm %s2834_s4, %s2284_s11 }
  0x9e   : > { %s328_s29 = scalar_lea.vmem [#allocation11], %s2288_s12  ;;  %s1960_s6 = scalar_lea.hbm %s2532_s27, 256 }
  0x9f   : > { %1687 = dma.hbm_to_vmem [thread:$0]  (!%p2898_p1), %s2498_s20, 256, %s2501_s10, %s2308_s19, %s2881_s8, %s2881_s8, %s2880_s28  }
  0xa0   : > { %s335_s30 = sshll.u32 %s328_s29, 4  ;;  %p1961_p13 = scmp.ne.s32.totalorder %s2532_s27, %s1960_s6  ;;  %s2535_s30 = int_to_ptr.vmem [resolvable:$true] %s335_s30 }
  0xa1   : > { %s1965_s20 = scalar_lea.hbm %s2834_s4, 768  ;;  %p1966_p2 = scmp.lt.u32.totalorder %s2532_s27, %s2834_s4 }
  0xa2   : > { %p1963_p12 = pnand %p1961_p13, %p2314_p7  ;;  %p1967_p10 = scmp.lt.u32.totalorder %s1965_s20, %s1960_s6 }
  0xa3   : > { %p1969_p8 = scmp.lt.u32.totalorder %s1960_s6, %s2532_s27 }
  0xa4   : > { %p1964_p5 = pneg %p1963_p12  ;;  %p1968_p3 = por %p1967_p10, %p1966_p2 }
  0xa6   : > { %p1970_p11 = por %p1969_p8, %p1968_p3 }
  0xa8   : > { %p1971_p0 = pnand %p1970_p11, %p1964_p5 }
  0xaa   : > { %1974 = shalt.err (!%p1971_p0)
}
  0xab   : > { %s1975_s26 = scalar_lea.vmem %s2535_s30, 256  ;;  %s2162_s21 = smov [#allocation11]  }
  0xac   : > { %p1976_p4 = scmp.ne.s32.totalorder %s2535_s30, %s1975_s26  ;;  %s1980_s14 = sshll.u32 %s2162_s21, 4  ;;  %s1981_s14 = int_to_ptr.vmem [resolvable:$false] %s1980_s14 }
  0xad   : > { %s1982_s1 = scalar_lea.vmem %s1981_s14, 512  ;;  %p1983_p13 = scmp.lt.s32.totalorder %s2535_s30, %s1981_s14 }
  0xae   : > { %p1978_p9 = pnand %p1976_p4, %p2314_p7  ;;  %p1984_p12 = scmp.lt.s32.totalorder %s1982_s1, %s1975_s26 }
  0xb0   : > { %p1979_p6 = pneg %p1978_p9  ;;  %p1985_p2 = por %p1984_p12, %p1983_p13 }
  0xb2   : > { %p1986_p10 = pnand %p1985_p2, %p1979_p6 }
  0xb4   : > { %1989 = shalt.err (!%p1986_p10)
}
  0xb5   : > { %1693 = dma.hbm_to_vmem [thread:$0]  (!%p2898_p1), %s2532_s27, 256, %s2535_s30, %s2359_s18, %s2881_s8, %s2881_s8, %s2880_s28  }
  0xb6   : > { %s2566_s6 = scalar_lea.hbm %s2835_s5, %s2284_s11  ;;  %s349_s3 = scalar_lea.vmem [#allocation12], %s2288_s12 }
  0xb7   : > { %s356_s19 = sshll.u32 %s349_s3, 4  ;;  %s2899_s20 = sand.u32 1, %s2122_s23   ;;  %s2569_s19 = int_to_ptr.vmem [resolvable:$true] %s356_s19 }
  0xb8   : > { %s2573_s10 = scalar_lea.sflag [#allocation13], %s2899_s20  ;;  %s1990_s9 = scalar_lea.hbm %s2566_s6, 256 }
  0xb9   : > { %p1991_p5 = scmp.ne.s32.totalorder %s2566_s6, %s1990_s9  ;;  %s1995_s11 = scalar_lea.hbm %s2835_s5, 768 }
  0xba   : > { %p1996_p11 = scmp.lt.u32.totalorder %s2566_s6, %s2835_s5  ;;  %p1997_p0 = scmp.lt.u32.totalorder %s1995_s11, %s1990_s9 }
  0xbb   : > { %p1993_p3 = pnand %p1991_p5, %p2314_p7  ;;  %p1999_p9 = scmp.lt.u32.totalorder %s1990_s9, %s2566_s6 }
  0xbc   : > { %p1998_p4 = por %p1997_p0, %p1996_p11 }
  0xbd   : > { %p1994_p8 = pneg %p1993_p3 }
  0xbe   : > { %p2000_p6 = por %p1999_p9, %p1998_p4 }
  0xc0   : > { %p2001_p13 = pnand %p2000_p6, %p1994_p8 }
  0xc2   : > { %2004 = shalt.err (!%p2001_p13)
}
  0xc3   : > { %s2005_s12 = scalar_lea.vmem %s2569_s19, 256  ;;  %s2163_s30 = smov [#allocation12]  }
  0xc4   : > { %p2006_p12 = scmp.ne.s32.totalorder %s2569_s19, %s2005_s12  ;;  %s2010_s26 = sshll.u32 %s2163_s30, 4  ;;  %s2011_s26 = int_to_ptr.vmem [resolvable:$false] %s2010_s26 }
  0xc5   : > { %s2012_s21 = scalar_lea.vmem %s2011_s26, 512  ;;  %p2013_p5 = scmp.lt.s32.totalorder %s2569_s19, %s2011_s26 }
  0xc6   : > { %p2008_p2 = pnand %p2006_p12, %p2314_p7  ;;  %p2014_p3 = scmp.lt.s32.totalorder %s2012_s21, %s2005_s12 }
  0xc8   : > { %p2009_p10 = pneg %p2008_p2  ;;  %p2015_p11 = por %p2014_p3, %p2013_p5 }
  0xca   : > { %p2016_p0 = pnand %p2015_p11, %p2009_p10 }
  0xcc   : > { %2019 = shalt.err (!%p2016_p0)
}
  0xcd   : > { %s2164_s14 = smov 128   ;;  %s2165_s1 = smov 8  }
  0xce   : > { %1696 = dma.hbm_to_vmem [thread:$0]  (!%p2898_p1), %s2566_s6, 256, %s2569_s19, %s2573_s10, %s2164_s14, %s2164_s14, %s2165_s1  }
  0xcf   : > { %s2900_s13 = sld [smem:[#allocation26_spill]] }
  0xd5   : > { %p2901_p7 = scmp.ne.s32.totalorder %s2900_s13, 0 }
  0xd6   : > { %s2902_s17 = sld [smem:[#allocation30_spill]] (!%p2901_p7)  ;;  %s2600_s29 = sand.u32 (!%p2901_p7), 1, %s2130_s25  }
  0xd7   : > { %368 = sbr.rel (%p2901_p7) target bundleno = 2793 (0xae9), region = 44  ;;  %s1513_s3 = sshll.u32 (!%p2901_p7), %s2600_s29, 3 }
  0xd8   : > { %s371_s20 = scalar_lea.sflag (!%p2901_p7), [#allocation4], %s2600_s29  ;;  %s374_s9 = scalar_lea.vmem (!%p2901_p7), [#allocation3], %s1513_s3 }
  0xdc   : > { %p2903_p8 = scmp.ne.s32.totalorder (!%p2901_p7), %s2902_s17, 0 }
  0xde   : > { %2093 = dma.done.wait (%p2903_p8), %s371_s20, 128  }
  0xdf   : > { %2095 = vsyncadd (%p2903_p8), %s371_s20, 4294967168  ;;  %s2904_s18 = sld [smem:[#allocation27_spill]]  ;;  %s2905_s16 = sld [smem:[#allocation20_spill]] }
  0xe0   : > { %s2906_s6 = sld [smem:[#allocation31_spill]] }
  0xe5   : > { %s379_s19 = sand.u32 1, %s2904_s18   ;;  %s381_s10 = sand.u32 1, %s2905_s16  }
  0xe6   : > { %s2610_s28 = sshll.u32 %s381_s10, 4  ;;  %s380_s11 = scalar_lea.sflag [#allocation7], %s379_s19 }
  0xe7   : > { %s383_s8 = scalar_lea.vmem [#allocation6], %s2610_s28  ;;  %p2907_p1 = scmp.ne.s32.totalorder %s2906_s6, 0 }
  0xe9   : > { %2097 = dma.done.wait (%p2907_p1), %s380_s11, 512  }
  0xea   : > { %2099 = vsyncadd (%p2907_p1), %s380_s11, 4294966784  ;;  %s392_s27 = scalar_lea.vmem [#allocation8], %s2610_s28  ;;  %s398_s12 = scalar_lea.sflag [#allocation10], %s379_s19 }
  0xeb   : > { %s401_s30 = scalar_lea.vmem [#allocation9], %s2610_s28 }
  0xec   : > { %2101 = dma.done.wait (%p2907_p1), %s398_s12, 512  }
  0xed   : > { %2103 = vsyncadd (%p2907_p1), %s398_s12, 4294966784  ;;  %s410_s26 = scalar_lea.vmem [#allocation11], %s2610_s28  ;;  %s416_s21 = scalar_lea.sflag [#allocation13], %s381_s10 }
  0xee   : > { %s419_s14 = scalar_lea.vmem [#allocation12], %s2610_s28 }
  0xef   : > { %2105 = dma.done.wait (%p2907_p1), %s416_s21, 256  }
  0xf0   : > { %2107 = vsyncadd (%p2907_p1), %s416_s21, 4294967040  ;;  %s2629_s1 = scalar_lea.vmem [#allocation14], %s1513_s3  ;;  %s2908_s13 = sld [smem:[#allocation22_spill]] }
  0xf6   : > { %p1520_p4 = scmp.ne.s32.totalorder %s2908_s13, 0 }
  0xf7   : > { %v478_v0 = vld [vmem:[%s374_s9] sm:$0xff] (!%p1520_p4)  ;;  %vm479_vm0 = vcmask (!%p1520_p4), 261120  }
  0xf8   : > { %477 = sbr.rel (%p1520_p4) target bundleno = 255 (0xff), region = 72  ;;  %480 = vst.msk [vmem:[%s2629_s1] sm:$0xff] (!%p1520_p4), %vm479_vm0, %v478_v0 }
  0xff PF: > { %v1812_v1 = vld [vmem:[%s383_s8] sm:$0xff]   ;;  %v545_v2 = vlaneseq  ;;  %v2166_v3 = vmov 0.0   ;;  %v1813_v4 = vld [vmem:[%s383_s8 + $0x8] sm:$0xff]   ;;  %vm2167_vm1 = vmmov 0   ;;  %vm501_vm2 = vcmask 261120   ;;  %s2168_s17 = smov 32  }
 0x100   : > { %1584 = vmatprep.subr.bf16.mxu0 %v2166_v3  ;;  %1592 = vmatprep.subr.bf16.mxu1 %v2166_v3  ;;  %v2638_v5 = vld [vmem:[%s2629_s1] sm:$0xff]  ;;  %s2169_s3 = smov 88   ;;  %s2170_s20 = smov 96   ;;  %vm574_vm3 = vcmask 64512   ;;  %vm639_vm4 = vcmask 1043456   ;;  %vm684_vm5 = vcmask 60416  }
 0x101   : > { %1585 = vmatpush3.bf16.msra.mxu0 %v1812_v1  ;;  %1588 = vmatprep.mubr.msk.bf16.mxu0 %vm2167_vm1, %v2166_v3  ;;  %v2642_v6 = vld [vmem:[%s419_s14] sm:$0xff]  ;;  %v2644_v7 = vshrl.u32 %v545_v2, 7  ;;  %v484_v9 = vpack.c.bf16 %v2638_v5, %v2638_v5  ;;  %s2171_s9 = smov 80   ;;  %s2172_s18 = smov 120   ;;  %vm804_vm6 = vcmask 126016   ;;  %vm923_vm7 = vcmask 191616  }
 0x102   : > { %1586 = vmatprep.subr.bf16.mxu0 %v2166_v3  ;;  %1594 = vmatprep.mubr.msk.bf16.mxu1 %vm2167_vm1, %v2166_v3  ;;  %s2173_s16 = smov 72   ;;  %s2174_s6 = smov 112   ;;  %vm1042_vm8 = vcmask 257216  }
 0x103   : > { %v553_v8 = vsub.s32 1, %v2644_v7  ;;  %v547_v11 = vsub.s32 0, %v2644_v7  ;;  %s2175_s19 = smov 104   ;;  %v563_v48 = vsub.s32 2, %v2644_v7  ;;  %s2176_s10 = smov 64  }
 0x104   : > { %s2177_s11 = smov 48   ;;  %s2178_s8 = smov 40  }
 0x105   : > { %1587 = vmatpush3.bf16.msra.mxu0 %v1813_v4  ;;  %v554_v10 = vrot.slane %v2642_v6, %v553_v8  ;;  %v548_v13 = vrot.slane %v2642_v6, %v547_v11  ;;  %v564_v49 = vrot.slane %v2642_v6, %v563_v48  ;;  %s2179_s12 = smov 56   ;;  %s2180_s21 = smov 8  }
 0x106   : > { %1598 = vmatprep.subr.bf16.mxu0 %v2166_v3  ;;  %s2181_s13 = smov 16   ;;  %s1288_s28 = scalar_lea.sflag [#allocation5], %s2600_s29 }
 0x107   : > { %556 = vrot.lane.b32.xlu0 %v554_v10, %s2168_s17  ;;  %s2182_s17 = smov 24   ;;  %p2911_p6 = scmp.ne.s32.totalorder %s2894_s22, 0 }
 0x108   : > { %1589 = vmatmul.mubr.msk.bf16.vlgmr.msra.gmra.mrb[0].mxu0 %vm501_vm2, %v484_v9 }
 0x109   : > { %1600 = vmatprep.mubr.msk.bf16.mxu0 %vm2167_vm1, %v2166_v3 }
 0x179   : > { %v557_v12 = vpop.permute.xlu0 %556 }
 0x1db   : > { %v2663_v14 = vpop.f32.mrb[0].mxu0 }
 0x1dc   : > { %v559_v15 = vadd.f32 %v557_v12, %v2663_v14  ;;  %v1590_v16 = vpop.f32.mrb[1].mxu0  ;;  %v549_v18 = vadd.f32 %v548_v13, %v2663_v14 }
 0x1dd   : > { %v542_v17 = vpop.f32.mrb[2].mxu0 }
 0x1de   : > { %v560_v19 = vpack.c.bf16 %v559_v15, %v559_v15  ;;  %v1591_v20 = vpop.f32.mrb[3].mxu0  ;;  %v550_v21 = vpack.c.bf16 %v549_v18, %v549_v18 }
 0x1e0   : > { %689 = vrot.lane.b32.xlu1 %v560_v19, %s2169_s3  ;;  %572 = vrot.lane.b32.xlu0 %v560_v19, %s2170_s20 }
 0x1e4   : > { %808 = vrot.lane.b32.xlu0 %v560_v19, %s2171_s9  ;;  %687 = vrot.lane.b32.xlu1 %v550_v21, %s2172_s18  ;;  %s2910_s9 = sld [smem:[#allocation36_spill]] }
 0x1e8   : > { %927 = vrot.lane.b32.xlu0 %v560_v19, %s2173_s16  ;;  %806 = vrot.lane.b32.xlu1 %v550_v21, %s2174_s6  ;;  %s2183_s16 = smov [#allocation14]  }
 0x1e9   : > { %s2024_s6 = sshll.u32 %s2183_s16, 4  ;;  %s2025_s6 = int_to_ptr.vmem [resolvable:$false] %s2024_s6 }
 0x1ec   : > { %925 = vrot.lane.b32.xlu1 %v550_v21, %s2175_s19  ;;  %s2026_s19 = scalar_lea.vmem %s2025_s6, 256 }
 0x252   : > { %v573_v22 = vpop.permute.xlu0 %572  ;;  %v690_v24 = vpop.permute.xlu1 %689 }
 0x253   : > { %v579_v23 = vsel %vm574_vm3, %v573_v22, 0  ;;  %v695_v25 = vsel %vm574_vm3, %v690_v24, 0 }
 0x254   : > { %1593 = vmatpush3.bf16.xpose.msra.mxu1 %v579_v23 }
 0x255   : > { %1604 = vmatprep.subr.bf16.mxu1 %v2166_v3 }
 0x256   : > { %v809_v26 = vpop.permute.xlu0 %808  ;;  %v688_v27 = vpop.permute.xlu1 %687 }
 0x257   : > { %v814_v28 = vsel %vm574_vm3, %v809_v26, 0 }
 0x25a   : > { %v928_v29 = vpop.permute.xlu0 %927  ;;  %v807_v30 = vpop.permute.xlu1 %806 }
 0x25b   : > { %1595 = vmatmul.mubr.msk.bf16.vlgmr.msra.gmra.mrb[0].mxu1 %vm574_vm3, %v550_v21  ;;  %v933_v31 = vsel %vm574_vm3, %v928_v29, 0 }
 0x25c   : > { %1605 = vmatpush3.bf16.xpose.msra.mxu1 %v695_v25  ;;  %1606 = vmatprep.mubr.msk.bf16.mxu1 %vm2167_vm1, %v2166_v3 }
 0x25d   : > { %1616 = vmatprep.subr.bf16.mxu1 %v2166_v3 }
 0x25e   : > { %v926_v32 = vpop.permute.xlu1 %925 }
 0x263   : > { %1607 = vmatmul.mubr.msk.bf16.vlgmr.msra.gmra.mrb[4].mxu1 %vm574_vm3, %v688_v27 }
 0x264   : > { %1617 = vmatpush3.bf16.xpose.msra.mxu1 %v814_v28  ;;  %1618 = vmatprep.mubr.msk.bf16.mxu1 %vm2167_vm1, %v2166_v3 }
 0x265   : > { %1628 = vmatprep.subr.bf16.mxu1 %v2166_v3 }
 0x26b   : > { %1619 = vmatmul.mubr.msk.bf16.vlgmr.msra.gmra.mrb[8].mxu1 %vm574_vm3, %v807_v30 }
 0x26c   : > { %1629 = vmatpush3.bf16.xpose.msra.mxu1 %v933_v31  ;;  %1630 = vmatprep.mubr.msk.bf16.mxu1 %vm2167_vm1, %v2166_v3 }
 0x26d   : > { %1640 = vmatprep.subr.bf16.mxu1 %v2166_v3 }
 0x273   : > { %1631 = vmatmul.mubr.msk.bf16.vlgmr.msra.gmra.mrb[12].mxu1 %vm574_vm3, %v926_v32 }
 0x274   : > { %1644 = vmatprep.mubr.msk.bf16.mxu1 %vm2167_vm1, %v2166_v3 }
 0x32e   : > { %v615_v33 = vpop.f32.mrb[0].mxu1 }
 0x32f   : > { %v1596_v34 = vpop.f32.mrb[1].mxu1  ;;  %v621_v35 = vsel %vm574_vm3, %v615_v33, -inf }
 0x330   : > { %622 = vmax.xlane.f32.xlu0 %v621_v35  ;;  %v618_v36 = vpop.f32.mrb[2].mxu1 }
 0x331   : > { %v1597_v37 = vpop.f32.mrb[3].mxu1 }
 0x336   : > { %v731_v38 = vpop.f32.mrb[4].mxu1 }
 0x337   : > { %v1608_v39 = vpop.f32.mrb[5].mxu1  ;;  %v737_v40 = vsel %vm574_vm3, %v731_v38, -inf }
 0x338   : > { %738 = vmax.xlane.f32.xlu1 %v737_v40  ;;  %v734_v41 = vpop.f32.mrb[6].mxu1 }
 0x339   : > { %v1609_v42 = vpop.f32.mrb[7].mxu1 }
 0x33e   : > { %v850_v43 = vpop.f32.mrb[8].mxu1 }
 0x33f   : > { %v1620_v44 = vpop.f32.mrb[9].mxu1  ;;  %v856_v45 = vsel %vm574_vm3, %v850_v43, -inf }
 0x340   : > { %857 = vmax.xlane.f32.xlu0 %v856_v45  ;;  %v853_v46 = vpop.f32.mrb[10].mxu1 }
 0x341   : > { %v1621_v47 = vpop.f32.mrb[11].mxu1 }
 0x346   : > { %v969_v50 = vpop.f32.mrb[12].mxu1 }
 0x347   : > { %v1632_v51 = vpop.f32.mrb[13].mxu1  ;;  %v975_v52 = vsel %vm574_vm3, %v969_v50, -inf }
 0x348   : > { %976 = vmax.xlane.f32.xlu0 %v975_v52  ;;  %v972_v53 = vpop.f32.mrb[14].mxu1 }
 0x349   : > { %v1633_v54 = vpop.f32.mrb[15].mxu1  ;;  %566 = vrot.lane.b32.xlu1 %v564_v49, %s2176_s10 }
 0x34a   : > { %v1814_v54 = vld [vmem:[%s392_s27] sm:$0xff]  }
 0x34b   : > { %1641 = vmatpush3.bf16.msra.mxu1 %v1814_v54 }
 0x34c   : > { %1642 = vmatprep.subr.bf16.mxu1 %v2166_v3 }
 0x3bd   : > { %v623_v55 = vpop.xlane.xlu0 %622 }
 0x3be   : > { %v624_v56 = vsub.f32 %v615_v33, %v623_v55 }
 0x3c0   : > { %v625_v57 = vmul.f32 1.442695, %v624_v56  ;;  %v1815_v56 = vld [vmem:[%s392_s27 + $0x8] sm:$0xff]   ;;  %s2909_s27 = sld [smem:[#allocation23_spill]] }
 0x3c1   : > { %1643 = vmatpush3.bf16.msra.mxu1 %v1815_v56 }
 0x3c2   : > { %1820 = vpow2.f32 %v625_v57  ;;  %1656 = vmatprep.subr.bf16.mxu1 %v2166_v3 }
 0x3c5   : > { %v739_v58 = vpop.xlane.xlu1 %738 }
 0x3c6   : > { %v740_v59 = vsub.f32 %v731_v38, %v739_v58 }
 0x3c8   : > { %v741_v60 = vmul.f32 1.442695, %v740_v59 }
 0x3c9   : > { %v567_v61 = vpop.permute.xlu1 %566 }
 0x3ca   : > { %1822 = vpow2.f32 %v741_v60  ;;  %v569_v62 = vadd.f32 %v567_v61, %v2663_v14 }
 0x3cc   : > { %v1821_v63 = vpop.eup %1820  ;;  %v570_v0 = vpack.c.bf16 %v569_v62, %v569_v62 }
 0x3cd   : > { %v858_v1 = vpop.xlane.xlu0 %857  ;;  %v627_v2 = vsel %vm574_vm3, %v1821_v63, 0.0 }
 0x3ce   : > { %v859_v4 = vsub.f32 %v850_v43, %v858_v1  ;;  %634 = vrot.lane.b32.xlu1 %v570_v0, %s2176_s10  ;;  %628 = vadd.xlane.f32.xlu0 %v627_v2 }
 0x3d0   : > { %v860_v9 = vmul.f32 1.442695, %v859_v4 }
 0x3d2   : > { %1824 = vpow2.f32 %v860_v9  ;;  %868 = vrot.lane.b32.xlu1 %v570_v0, %s2177_s11 }
 0x3d4   : > { %v1823_v10 = vpop.eup %1822 }
 0x3d5   : > { %v977_v12 = vpop.xlane.xlu0 %976  ;;  %v743_v13 = vsel %vm574_vm3, %v1823_v10, 0.0 }
 0x3d6   : > { %v978_v15 = vsub.f32 %v969_v50, %v977_v12  ;;  %987 = vrot.lane.b32.xlu1 %v570_v0, %s2178_s8  ;;  %744 = vadd.xlane.f32.xlu0 %v743_v13  ;;  %v1051_v12 = vsub.s32 3, %v2644_v7 }
 0x3d8   : > { %v979_v14 = vmul.f32 1.442695, %v978_v15  ;;  %v1052_v13 = vrot.slane %v2642_v6, %v1051_v12 }
 0x3da   : > { %1826 = vpow2.f32 %v979_v14 }
 0x3dc   : > { %v1825_v16 = vpop.eup %1824 }
 0x3dd   : > { %v862_v17 = vsel %vm574_vm3, %v1825_v16, 0.0 }
 0x3de   : > { %863 = vadd.xlane.f32.xlu0 %v862_v17 }
 0x3e4   : > { %v1827_v18 = vpop.eup %1826 }
 0x3e5   : > { %v981_v19 = vsel %vm574_vm3, %v1827_v18, 0.0 }
 0x3e6   : > { %982 = vadd.xlane.f32.xlu0 %v981_v19 }
 0x3fc   : > { %749 = vrot.lane.b32.xlu0 %v570_v0, %s2179_s12 }
 0x440   : > { %v635_v20 = vpop.permute.xlu1 %634 }
 0x441   : > { %v641_v21 = vsel %vm639_vm4, %v635_v20, 0 }
 0x442   : > { %1599 = vmatpush3.bf16.msra.mxu0 %v641_v21 }
 0x443   : > { %1610 = vmatprep.subr.bf16.mxu0 %v2166_v3 }
 0x444   : > { %v869_v33 = vpop.permute.xlu1 %868 }
 0x445   : > { %v874_v36 = vsel %vm639_vm4, %v869_v33, 0 }
 0x448   : > { %v988_v38 = vpop.permute.xlu1 %987 }
 0x449   : > { %v993_v41 = vsel %vm639_vm4, %v988_v38, 0 }
 0x45b   : > { %v629_v22 = vpop.xlane.xlu0 %628 }
 0x45c   : > { %1828 = vrcp.f32 %v629_v22 }
 0x463   : > { %v745_v24 = vpop.xlane.xlu0 %744 }
 0x464   : > { %1830 = vrcp.f32 %v745_v24 }
 0x466   : > { %v1829_v23 = vpop.eup %1828 }
 0x467   : > { %v631_v25 = vmul.f32 %v1829_v23, %v1821_v63 }
 0x469   : > { %v632_v26 = vpack.c.bf16 %v631_v25, %v631_v25 }
 0x46b   : > { %1601 = vmatmul.mubr.msk.bf16.vlgmr.msra.gmra.mrb[4].mxu0 %vm574_vm3, %v632_v26  ;;  %v864_v27 = vpop.xlane.xlu0 %863  ;;  %v1816_v26 = vld [vmem:[%s401_s30] sm:$0xff]  }
 0x46c   : > { %1612 = vmatprep.mubr.msk.bf16.mxu0 %vm2167_vm1, %v2166_v3  ;;  %1832 = vrcp.f32 %v864_v27  ;;  %v1817_v27 = vld [vmem:[%s401_s30 + $0x8] sm:$0xff]   ;;  %s1545_s30 = sshll.u32 %s2909_s27, 7 }
 0x46d   : > { %s2765_s18 = scalar_lea.hbm %s2910_s9, %s1545_s30 }
 0x46e   : > { %v1831_v28 = vpop.eup %1830 }
 0x46f   : > { %v747_v30 = vmul.f32 %v1831_v28, %v1823_v10 }
 0x471   : > { %v748_v34 = vpack.c.bf16 %v747_v30, %v747_v30  ;;  %v1125_v30 = vsub.s32 4, %v2644_v7 }
 0x473   : > { %v983_v29 = vpop.xlane.xlu0 %982 }
 0x474   : > { %1834 = vrcp.f32 %v983_v29 }
 0x476   : > { %v1833_v35 = vpop.eup %1832 }
 0x477   : > { %v750_v31 = vpop.permute.xlu0 %749  ;;  %v866_v37 = vmul.f32 %v1833_v35, %v1825_v16 }
 0x478   : > { %v755_v32 = vsel %vm639_vm4, %v750_v31, 0  ;;  %v1130_v31 = vsub.s32 5, %v2644_v7 }
 0x479   : > { %1611 = vmatpush3.bf16.msra.mxu0 %v755_v32  ;;  %v867_v39 = vpack.c.bf16 %v866_v37, %v866_v37  ;;  %v1126_v32 = vrot.slane %v2642_v6, %v1125_v30 }
 0x47a   : > { %1622 = vmatprep.subr.bf16.mxu0 %v2166_v3  ;;  %v1131_v35 = vrot.slane %v2642_v6, %v1130_v31 }
 0x47c   : > { %1613 = vmatmul.mubr.msk.bf16.vlgmr.msra.gmra.mrb[8].mxu0 %vm574_vm3, %v748_v34 }
 0x47d   : > { %1623 = vmatpush3.bf16.msra.mxu0 %v874_v36  ;;  %1624 = vmatprep.mubr.msk.bf16.mxu0 %vm2167_vm1, %v2166_v3 }
 0x47e   : > { %1634 = vmatprep.subr.bf16.mxu0 %v2166_v3  ;;  %v1835_v40 = vpop.eup %1834 }
 0x47f   : > { %v985_v42 = vmul.f32 %v1835_v40, %v1827_v18  ;;  %v1819_v40 = vld [vmem:[%s410_s26 + $0x8] sm:$0xff]  }
 0x481   : > { %v986_v43 = vpack.c.bf16 %v985_v42, %v985_v42 }
 0x484   : > { %1625 = vmatmul.mubr.msk.bf16.vlgmr.msra.gmra.mrb[12].mxu0 %vm574_vm3, %v867_v39  ;;  %v1818_v39 = vld [vmem:[%s410_s26] sm:$0xff]   ;;  %s1301_s26 = sshll.u32 %s2629_s1, 4  ;;  %s2767_s26 = int_to_ptr.vmem [resolvable:$true] %s1301_s26 }
 0x485   : > { %1635 = vmatpush3.bf16.msra.mxu0 %v993_v41  ;;  %1636 = vmatprep.mubr.msk.bf16.mxu0 %vm2167_vm1, %v2166_v3  ;;  %v1140_v41 = vsub.s32 6, %v2644_v7  ;;  %p2027_p2 = scmp.lt.s32.totalorder %s2767_s26, %s2025_s6 }
 0x486   : > { %1648 = vmatprep.subr.bf16.mxu0 %v2166_v3 }
 0x487   : > { %v1141_v42 = vrot.slane %v2642_v6, %v1140_v41 }
 0x48c   : > { %1637 = vmatmul.mubr.msk.bf16.vlgmr.msra.gmra.mrb[16].mxu0 %vm574_vm3, %v986_v43 }
 0x48d   : > { %1652 = vmatprep.mubr.msk.bf16.mxu0 %vm2167_vm1, %v2166_v3  ;;  %1649 = vmatpush3.bf16.msra.mxu0 %v1816_v26 }
 0x48e   : > { %1650 = vmatprep.subr.bf16.mxu0 %v2166_v3 }
 0x491   : > { %1651 = vmatpush3.bf16.msra.mxu0 %v1817_v27 }
 0x53e   : > { %v677_v44 = vpop.f32.mrb[4].mxu0 }
 0x53f   : > { %v683_v45 = vpack.c.bf16 %v677_v44, %v677_v44  ;;  %v1602_v46 = vpop.f32.mrb[5].mxu0 }
 0x540   : > { %v680_v47 = vpop.f32.mrb[6].mxu0 }
 0x541   : > { %685 = vst.msk [vmem:[#allocation2] sm:$0xf] %vm684_vm5, %v683_v45  ;;  %v1603_v48 = vpop.f32.mrb[7].mxu0 }
 0x54f   : > { %v791_v49 = vpop.f32.mrb[8].mxu0 }
 0x550   : > { %v1553_v50 = vpack.c.bf16 %v791_v49, %v791_v49  ;;  %v1614_v51 = vpop.f32.mrb[9].mxu0 }
 0x551   : > { %v794_v52 = vpop.f32.mrb[10].mxu0 }
 0x552   : > { %801 = vrot.lane.b32.xlu1 %v1553_v50, %s2180_s21  ;;  %v1615_v53 = vpop.f32.mrb[11].mxu0  ;;  %v1205_v50 = vsub.s32 7, %v2644_v7 }
 0x557   : > { %v910_v55 = vpop.f32.mrb[12].mxu0 }
 0x558   : > { %v1554_v57 = vpack.c.bf16 %v910_v55, %v910_v55  ;;  %v1626_v58 = vpop.f32.mrb[13].mxu0 }
 0x559   : > { %v913_v59 = vpop.f32.mrb[14].mxu0 }
 0x55a   : > { %920 = vrot.lane.b32.xlu1 %v1554_v57, %s2181_s13  ;;  %v1627_v60 = vpop.f32.mrb[15].mxu0 }
 0x55f   : > { %v1029_v61 = vpop.f32.mrb[16].mxu0 }
 0x560   : > { %v1555_v62 = vpack.c.bf16 %v1029_v61, %v1029_v61  ;;  %v1638_v63 = vpop.f32.mrb[17].mxu0 }
 0x561   : > { %v1032_v0 = vpop.f32.mrb[18].mxu0 }
 0x562   : > { %1039 = vrot.lane.b32.xlu1 %v1555_v62, %s2182_s17  ;;  %v1639_v1 = vpop.f32.mrb[19].mxu0 }
 0x563   : > { %v482_v1 = vld [vmem:[%s419_s14 + $0x8] sm:$0xff]  ;;  %s2020_s14 = scalar_lea.vmem %s2767_s26, 128 }
 0x564   : > { %p2021_p9 = scmp.ne.s32.totalorder %s2767_s26, %s2020_s14  ;;  %p2028_p10 = scmp.lt.s32.totalorder %s2026_s19, %s2020_s14 }
 0x566   : > { %p2022_p13 = pnand %p2021_p9, %p2911_p6  ;;  %p2029_p5 = por %p2028_p10, %p2027_p2 }
 0x568   : > { %p2023_p12 = pneg %p2022_p13 }
 0x56a   : > { %p2030_p3 = pnand %p2029_p5, %p2023_p12 }
 0x5c4   : > { %v802_v2 = vpop.permute.xlu1 %801 }
 0x5c5   : > { %805 = vst.msk [vmem:[#allocation2] sm:$0xf] %vm804_vm6, %v802_v2  ;;  %v1279_v2 = vrot.slane %v482_v1, %v547_v11 }
 0x5cc   : > { %v921_v4 = vpop.permute.xlu1 %920 }
 0x5cd   : > { %924 = vst.msk [vmem:[#allocation2] sm:$0xf] %vm923_vm7, %v921_v4 }
 0x5d4   : > { %v1040_v9 = vpop.permute.xlu1 %1039 }
 0x5d5   : > { %1043 = vst.msk [vmem:[#allocation2] sm:$0xf] %vm1042_vm8, %v1040_v9  ;;  %v1284_v9 = vrot.slane %v482_v1, %v553_v8 }
 0x5dc   : > { %v1044_v10 = vld [vmem:[#allocation2] sm:$0xf] }
 0x5dd   : > { %1645 = vmatmul.mubr.msk.bf16.vlgmr.msra.gmra.mrb[16].mxu1 %vm501_vm2, %v1044_v10 }
 0x5de   : > { %1660 = vmatprep.mubr.msk.bf16.mxu1 %vm2167_vm1, %v2166_v3  ;;  %1657 = vmatpush3.bf16.msra.mxu1 %v1818_v39 }
 0x5df   : > { %1658 = vmatprep.subr.bf16.mxu1 %v2166_v3  ;;  %v1206_v3 = vrot.slane %v2642_v6, %v1205_v50 }
 0x5e2   : > { %1659 = vmatpush3.bf16.msra.mxu1 %v1819_v40 }
 0x6b0   : > { %v1102_v15 = vpop.f32.mrb[16].mxu1 }
 0x6b1   : > { %v1103_v14 = vadd.f32 %v1102_v15, %v1052_v13  ;;  %v1646_v16 = vpop.f32.mrb[17].mxu1 }
 0x6b2   : > { %v1105_v17 = vpop.f32.mrb[18].mxu1 }
 0x6b3   : > { %v1647_v18 = vpop.f32.mrb[19].mxu1  ;;  %v1108_v19 = vadd.f32 %v1103_v14, %v2638_v5 }
 0x6b5   : > { %v1109_v20 = vsel %vm501_vm2, %v1108_v19, 0.0 }
 0x6b6   : > { %1110 = vadd.xlane.f32.xlu0 %v1109_v20 }
 0x743   : > { %v1111_v21 = vpop.xlane.xlu0 %1110 }
 0x744   : > { %v1113_v22 = vmul.f32 0.03125, %v1111_v21 }
 0x746   : > { %v1114_v23 = vsub.f32 %v1108_v19, %v1113_v22 }
 0x748   : > { %v1115_v24 = vmul.f32 %v1114_v23, %v1114_v23 }
 0x74a   : > { %v1116_v25 = vsel %vm501_vm2, %v1115_v24, 0.0 }
 0x74b   : > { %1117 = vadd.xlane.f32.xlu1 %v1116_v25 }
 0x7d8   : > { %v1118_v5 = vpop.xlane.xlu1 %1117 }
 0x7d9   : > { %v1119_v28 = vmul.f32 0.03125, %v1118_v5 }
 0x7db   : > { %v1120_v29 = vadd.f32 1e-12, %v1119_v28 }
 0x7dd   : > { %1836 = vrsqrt.f32 %v1120_v29 }
 0x7e7   : > { %v1837_v33 = vpop.eup %1836 }
 0x7e8   : > { %v1122_v34 = vmul.f32 %v1837_v33, %v1114_v23 }
 0x7ea   : > { %v1127_v36 = vmul.f32 %v1126_v32, %v1122_v34 }
 0x7ec   : > { %v1132_v37 = vadd.f32 %v1131_v35, %v1127_v36 }
 0x7ee   : > { %v1133_v38 = vpack.c.bf16 %v1132_v37, %v1132_v37 }
 0x7f0   : > { %1653 = vmatmul.mubr.msk.bf16.vlgmr.msra.gmra.mrb[20].mxu0 %vm501_vm2, %v1133_v38 }
 0x8c3   : > { %v1191_v43 = vpop.f32.mrb[20].mxu0 }
 0x8c4   : > { %v1192_v44 = vadd.f32 %v1191_v43, %v1141_v42  ;;  %v1654_v45 = vpop.f32.mrb[21].mxu0 }
 0x8c5   : > { %v1194_v46 = vpop.f32.mrb[22].mxu0 }
 0x8c6   : > { %v1197_v47 = vmax.f32 %v1192_v44, 0.0  ;;  %v1655_v48 = vpop.f32.mrb[23].mxu0 }
 0x8c8   : > { %v1198_v49 = vpack.c.bf16 %v1197_v47, %v1197_v47 }
 0x8ca   : > { %1661 = vmatmul.mubr.msk.bf16.vlgmr.msra.gmra.mrb[20].mxu1 %vm501_vm2, %v1198_v49 }
 0x99d   : > { %v1256_v51 = vpop.f32.mrb[20].mxu1 }
 0x99e   : > { %v1257_v52 = vadd.f32 %v1256_v51, %v1206_v3  ;;  %v1662_v53 = vpop.f32.mrb[21].mxu1 }
 0x99f   : > { %v1259_v54 = vpop.f32.mrb[22].mxu1 }
 0x9a0   : > { %v1663_v55 = vpop.f32.mrb[23].mxu1  ;;  %v1262_v56 = vadd.f32 %v1257_v52, %v1132_v37 }
 0x9a2   : > { %v1263_v57 = vsel %vm501_vm2, %v1262_v56, 0.0 }
 0x9a3   : > { %1264 = vadd.xlane.f32.xlu0 %v1263_v57 }
 0xa30   : > { %v1265_v58 = vpop.xlane.xlu0 %1264 }
 0xa31   : > { %v1266_v59 = vmul.f32 0.03125, %v1265_v58 }
 0xa33   : > { %v1267_v60 = vsub.f32 %v1262_v56, %v1266_v59 }
 0xa35   : > { %v1268_v61 = vmul.f32 %v1267_v60, %v1267_v60 }
 0xa37   : > { %v1269_v62 = vsel %vm501_vm2, %v1268_v61, 0.0 }
 0xa38   : > { %1270 = vadd.xlane.f32.xlu0 %v1269_v62 }
 0xac5   : > { %v1271_v6 = vpop.xlane.xlu0 %1270 }
 0xac6   : > { %v1272_v63 = vmul.f32 0.03125, %v1271_v6 }
 0xac8   : > { %v1273_v0 = vadd.f32 1e-12, %v1272_v63 }
 0xaca   : > { %1838 = vrsqrt.f32 %v1273_v0 }
 0xad4   : > { %v1839_v4 = vpop.eup %1838 }
 0xad5   : > { %v1275_v10 = vmul.f32 %v1839_v4, %v1267_v60 }
 0xad7   : > { %v1280_v12 = vmul.f32 %v1279_v2, %v1275_v10 }
 0xad9   : > { %v1285_v13 = vadd.f32 %v1284_v9, %v1280_v12 }
 0xadb   : > { %1286 = vst.msk [vmem:[%s2629_s1] sm:$0xff] %vm501_vm2, %v1285_v13 }
 0xadc   : > { %2033 = shalt.err (!%p2030_p3)
}
 0xadd   : > { %s2034_s29 = scalar_lea.hbm %s2765_s18, 128  ;;  %s2038_s11 = scalar_lea.hbm %s2910_s9, 256 }
 0xade   : > { %p2035_p11 = scmp.ne.s32.totalorder %s2765_s18, %s2034_s29  ;;  %p2039_p8 = scmp.lt.u32.totalorder %s2765_s18, %s2910_s9 }
 0xadf   : > { %p2040_p1 = scmp.lt.u32.totalorder %s2038_s11, %s2034_s29  ;;  %p2042_p9 = scmp.lt.u32.totalorder %s2034_s29, %s2765_s18 }
 0xae0   : > { %p2036_p0 = pnand %p2035_p11, %p2911_p6 }
 0xae1   : > { %p2041_p4 = por %p2040_p1, %p2039_p8 }
 0xae2   : > { %p2037_p7 = pneg %p2036_p0 }
 0xae3   : > { %p2043_p13 = por %p2042_p9, %p2041_p4 }
 0xae5   : > { %p2044_p12 = pnand %p2043_p13, %p2037_p7 }
 0xae7   : > { %2047 = shalt.err (!%p2044_p12)
}
 0xae8   : > { %1676 = dma.vmem_to_hbm [thread:$0]  (%p2911_p6), %s2767_s26, 128, %s2765_s18, %s1288_s28  }
 0xae9 PF: > { %p1702_p2 = scmp.ge.s32.totalorder %s2154_s7, 2  ;;  %s1313_s21 = sand.u32 1, %s2126_s24  }
 0xaea   : > { %p2912_p10 = scmp.ne.s32.totalorder %s2895_s15, 0  ;;  %s1314_s13 = scalar_lea.sflag [#allocation5], %s1313_s21 }
 0xaec   : > { %p1698_p5 = pnand %p1702_p2, %p2912_p10 }
 0xaee   : > { %2109 = dma.done.wait (!%p1698_p5), %s1314_s13, 128  }
 0xaef   : > { %2111 = vsyncadd (!%p1698_p5), %s1314_s13, 4294967168  ;;  %s31_s7 = sadd.s32 1, %s2154_s7   ;;  %s2913_s21 = sld [smem:[#allocation20_spill]] }
 0xaf0   : > { %p28_p3 = scmp.ge.s32.totalorder %s31_s7, 8   ;;  %s2914_s17 = sld [smem:[#allocation32_spill]] }
 0xaf1   : > { %s2915_s27 = sld [smem:[#allocation21_spill]]  ;;  %s2916_s26 = sld [smem:[#allocation33_spill]] }
 0xaf2   : > { %s2917_s30 = sld [smem:[#allocation24_spill]]  ;;  %s2918_s28 = sld [smem:[#allocation25_spill]] }
 0xaf3   : > { %s2919_s29 = sld [smem:[#allocation28_spill]]  ;;  %s2920_s3 = sld [smem:[#allocation29_spill]] }
 0xaf4   : > { %s2921_s22 = smov %s2122_s23  ;;  %s2923_s24 = smov %s2130_s25 }
 0xaf5   :  { %30 = sbr.rel (!%p28_p3) target bundleno = 19 (0x13), region = 154 }
 0xaf6   : > { %s2922_s23 = smov %s2914_s17 }
 0xaf7   : > { %s2924_s25 = smov %s2915_s27 }
 0xaf8   : > { %s2925_s27 = smov %s2917_s30 }
 0xaf9   : > { %s2926_s30 = smov %s2920_s3 }
 0xafc   :  { %1319 = vsyncpa [#allocation4], 1 }
 0xafd   :  { %1321 = vsyncpa [#allocation4 + $0x1], 1 }
 0xafe   :  { %1322 = vsyncpa [#allocation7], 1 }
 0xaff   :  { %1324 = vsyncpa [#allocation7 + $0x1], 1 }
 0xb00   :  { %1325 = vsyncpa [#allocation10], 1 }
 0xb01   :  { %1327 = vsyncpa [#allocation10 + $0x1], 1 }
 0xb02   :  { %1328 = vsyncpa [#allocation13], 1 }
 0xb03   :  { %1330 = vsyncpa [#allocation13 + $0x1], 1 }
 0xb04   :  { %1331 = vsyncpa [#allocation5], 1 }
 0xb05   :  { %1333 = vsyncpa [#allocation5 + $0x1], 1 }

</bundles_post_ra>
